<compile_context>
chip_gen: v7x
topology: tpu7x:2x2x1
jax: 0.10.0
libtpu: 0.0.40
codegen_flags: <defaults>
</compile_context>

<pallas_src>
import functools

import jax
import jax.numpy as jnp
import numpy as np
from jax.experimental import pallas as pl
from jax.experimental.pallas import tpu as pltpu


# --------------------------------------------------------------------------
# Kernel
# --------------------------------------------------------------------------
def mha_kernel(x_ref, wqkv_ref, wo_ref, g_emb_ref, b_emb_ref,
               g_out_ref, b_out_ref, o_ref, *, n_heads, d_head):
    b_blk, n_ent, d_model = x_ref.shape          # x block: (B_blk, N, d_model)
    hd = n_heads * d_head                        # LayerNorm-embed width
    rows = b_blk * n_ent
    inv_norm = 1.0 / (d_head ** 0.5)

    # Rows view of the batch block (leading/sublane reshape, minor dim fixed).
    # Residual kept in f32.
    x_rows = x_ref[...].reshape(rows, d_model).astype(jnp.float32)

    # ---- fused QKV projection: ONE 2-D matmul ------------------------------
    # bf16 operands, f32 accumulation.                              [fb 1]
    qkv = jnp.dot(x_rows.astype(jnp.bfloat16), wqkv_ref[...],
                  preferred_element_type=jnp.float32)      # (R, 3*H*dh), f32

    def layer_norm(y, g, b, eps=1e-6):
        mu = jnp.mean(y, axis=-1, keepdims=True)
        var = jnp.mean((y - mu) ** 2, axis=-1, keepdims=True)
        return (y - mu) * jax.lax.rsqrt(var + eps) * g + b

    g_emb = g_emb_ref[...]                       # (1, H*dh), f32
    b_emb = b_emb_ref[...]
    # layer_norm_embed acts on the full H*dh feature axis of each projection.
    q = layer_norm(qkv[:, 0 * hd:1 * hd], g_emb, b_emb)    # (R, H*dh)
    k = layer_norm(qkv[:, 1 * hd:2 * hd], g_emb, b_emb)
    v = layer_norm(qkv[:, 2 * hd:3 * hd], g_emb, b_emb)

    # ---- head regroup: (R, H*dh) -> (G=H*b_blk, N, dh) ----------------------
    # Static lane slices + leading-axis stack + leading/sublane reshape only.
    def to_groups(t):
        heads = jnp.stack([t[:, h * d_head:(h + 1) * d_head]
                           for h in range(n_heads)], axis=0)     # (H, R, dh)
        return heads.reshape(n_heads * b_blk, n_ent, d_head)     # (G, N, dh)

    qg = to_groups(q * inv_norm)                 # pre-scale q, not scores [fb 3]
    kg = to_groups(k)
    vg = to_groups(v)

    # ---- attention (f32; tiny contraction K, so no bf16 casts here) [fb 10] -
    s = jnp.einsum('gnd,gmd->gnm', qg, kg,
                   preferred_element_type=jnp.float32)           # (G, N, N)
    s = s - jnp.max(s, axis=-1, keepdims=True)
    p = jnp.exp(s)
    ctx = jnp.einsum('gnm,gmd->gnd', p, vg,
                     preferred_element_type=jnp.float32)         # (G, N, dh)
    # softmax denominator applied to ctx (N/d_head x fewer elements than p);
    # approx reciprocal runs on the (otherwise free) EUP slot.    [fb 3]
    ctx = ctx * pl.reciprocal(jnp.sum(p, axis=-1, keepdims=True), approx=True)

    # ---- concat heads back to rows: (G, N, dh) -> (R, H*dh) -----------------
    ctx_h = ctx.reshape(n_heads, rows, d_head)                   # (H, R, dh)
    ctx2d = jnp.concatenate([ctx_h[h] for h in range(n_heads)], axis=-1)

    # ---- output projection: ONE 2-D matmul (K = H*dh) + residual ---- [fb 2] -
    out = jnp.dot(ctx2d.astype(jnp.bfloat16), wo_ref[...],
                  preferred_element_type=jnp.float32) + x_rows   # (R, d_model)

    # ---- final LayerNorm over d_model (f32 statistics) ----------------------
    out = layer_norm(out, g_out_ref[...], b_out_ref[...])

    # TODO(synk): at transformer scale present a lane-dense (b_blk, N*d_model)
    # output slab (unmasked vst) instead of this d_model(=32)-lane store; the
    # required minor-dim relayout is not worth its cost at these shapes.
    o_ref[...] = out.reshape(b_blk, n_ent, d_model).astype(o_ref.dtype)


# --------------------------------------------------------------------------
# Sizing helpers
# --------------------------------------------------------------------------
def _padded_bytes(shape, itemsize, sublane=8):
    """VMEM bytes of one live value including (sublane, lane) tile padding."""
    if len(shape) == 1:
        shape = (1,) + tuple(shape)
    lead, s, l = shape[:-2], shape[-2], shape[-1]
    lanes = -(-int(l) // 128) * 128
    subl = -(-int(s) // sublane) * sublane
    n = 1
    for d in lead:
        n *= int(d)
    return n * subl * lanes * itemsize


def _vmem_capacity_bytes():
    """Generation-aware VMEM capacity (64 MiB v7x, 128 MiB v5e/v6e)."""
    try:
        return int(pltpu.get_tpu_info().vmem_capacity_bytes)
    except Exception:
        return 64 * 1024 * 1024          # conservative fallback (v7x)


def _choose_b_block(B, N, d_model, n_heads, d_head, vmem_budget_bytes):
    """Batch elements per grid step.

    * keeps >= 2 grid steps when B >= 2 so the "parallel" batch axis can be
      sharded across v7x's two TensorCores                          [fb 5]
    * grows the block toward ~1024 rows/step (amortizes ~0.35 us/step pipeline
      overhead) while the tile-padded footprint of every live f32 temporary
      plus double-buffered I/O and weight blocks stays under budget [fb 7, 8]
    """
    hd = n_heads * d_head
    f32, bf16 = 4, 2

    def footprint(b_blk):
        rows, groups = b_blk * N, b_blk * n_heads
        t = 0
        t += 2 * 2 * _padded_bytes((b_blk, N, d_model), f32)      # x/out blocks, double-buffered
        t += 2 * (_padded_bytes((d_model, 3 * hd), bf16, sublane=16)
                  + _padded_bytes((hd, d_model), bf16, sublane=16)
                  + 4 * _padded_bytes((1, hd), f32))              # weights + LN params
        t += 3 * _padded_bytes((rows, d_model), f32)              # x_rows, out (pre/post LN)
        t += _padded_bytes((rows, 3 * hd), f32)                   # fused qkv
        t += 4 * _padded_bytes((rows, hd), f32)                   # q, k, v, ctx2d
        t += 4 * _padded_bytes((groups, N, d_head), f32)          # qg, kg, vg, ctx
        t += 2 * _padded_bytes((groups, N, N), f32)               # scores, probs
        return t

    divisors = [c for c in range(1, B + 1) if B % c == 0]
    capped = [c for c in divisors if c <= B // 2] or divisors     # >= 2 steps if possible
    best = capped[0]
    for c in capped:
        if footprint(c) > vmem_budget_bytes:
            break
        best = c
        if c * N >= 1024:                                         # diminishing returns
            break
    return best


# --------------------------------------------------------------------------
# Wrapper
# --------------------------------------------------------------------------
def _pack_kernel_params(params):
    """PyTorch-layout params -> kernel layout (packed, pre-transposed)."""
    # Columns of each W^T are head-major, matching the PyTorch .view() split.
    w_qkv = jnp.concatenate(
        [params["wq"].T, params["wk"].T, params["wv"].T],
        axis=1).astype(jnp.bfloat16)                 # (d_model, 3*H*d_head)
    wo = params["wo"].T.astype(jnp.bfloat16)         # (H*d_v, d_model)
    g_emb = params["g_emb"].reshape(1, -1).astype(jnp.float32)
    b_emb = params["b_emb"].reshape(1, -1).astype(jnp.float32)
    g_out = params["g_out"].reshape(1, -1).astype(jnp.float32)
    b_out = params["b_out"].reshape(1, -1).astype(jnp.float32)
    return w_qkv, wo, g_emb, b_emb, g_out, b_out


def multi_head_attention(x, params, *, n_heads, d_q, d_v):
    """x: (B, N, d_model) float32. params: PyTorch-layout weight dict."""
    # The PyTorch module applies layer_norm_embed (size d_kq*n_heads) to the V
    # projection too, which only typechecks when d_v == d_kq.
    assert d_q == d_v, "module requires d_kq == d_v"
    B, N, d_model = x.shape
    dh = d_q
    hd = n_heads * dh

    w_qkv, wo, g_emb, b_emb, g_out, b_out = _pack_kernel_params(params)

    vmem_cap = _vmem_capacity_bytes()
    vmem_limit = min(max(vmem_cap // 2, 16 * 1024 * 1024), 96 * 1024 * 1024)
    b_blk = _choose_b_block(B, N, d_model, n_heads, dh,
                            vmem_budget_bytes=vmem_cap // 4)
    grid = (B // b_blk,)

    rows_total = B * N
    flops = int(2 * rows_total * d_model * 3 * hd        # fused QKV projection
                + 4 * B * n_heads * N * N * dh           # QK^T + PV
                + 2 * rows_total * hd * d_model)         # output projection
    transcendentals = int(B * n_heads * N * N + 4 * rows_total)
    bytes_accessed = int(2 * x.size * 4
                         + (w_qkv.size + wo.size) * 2
                         + (g_emb.size + b_emb.size + g_out.size + b_out.size) * 4)

    kernel = functools.partial(mha_kernel, n_heads=n_heads, d_head=dh)

    # Constant-index weight / LN-param blocks.  NOTE: at transformer scale add
    # pipeline_mode=pl.Buffered(1) (single-buffer the constants) and count them
    # once in the VMEM budget; negligible at d_model=32.             [fb 6]
    full2 = lambda a: pl.BlockSpec(a.shape, lambda i: (0, 0))

    return pl.pallas_call(
        kernel,
        out_shape=jax.ShapeDtypeStruct((B, N, d_model), x.dtype),
        grid_spec=pltpu.PrefetchScalarGridSpec(
            num_scalar_prefetch=0,
            grid=grid,
            in_specs=[
                pl.BlockSpec((b_blk, N, d_model), lambda i: (i, 0, 0)),  # x
                full2(w_qkv),                       # (d_model, 3*H*dh) bf16
                full2(wo),                          # (H*dh, d_model)   bf16
                full2(g_emb), full2(b_emb),         # layer_norm_embed
                full2(g_out), full2(b_out),         # layer_norm (output)
            ],
            out_specs=pl.BlockSpec((b_blk, N, d_model), lambda i: (i, 0, 0)),
        ),
        compiler_params=pltpu.CompilerParams(
            dimension_semantics=("parallel",),
            vmem_limit_bytes=int(vmem_limit)),
        cost_estimate=pl.CostEstimate(flops=flops,
                                      transcendentals=transcendentals,
                                      bytes_accessed=bytes_accessed),
    )(x, w_qkv, wo, g_emb, b_emb, g_out, b_out)


# --------------------------------------------------------------------------
# Params / reference
# --------------------------------------------------------------------------
def _orthogonal(key, out_dim, in_dim, gain):
    """Deterministic orthogonal init (mimics nn.init.orthogonal_)."""
    n = max(out_dim, in_dim)
    a = jax.random.normal(key, (n, n), dtype=jnp.float32)
    q, r = jnp.linalg.qr(a)
    q = q * jnp.sign(jnp.diag(r))[None, :]
    return gain * q[:out_dim, :in_dim]


def make_params(key, d_model, d_kq, d_v, n_heads):
    gain = float(np.sqrt(2.0))  # calculate_gain('relu')
    k0, k1, k2, k3 = jax.random.split(key, 4)
    hd_q = n_heads * d_kq
    hd_v = n_heads * d_v
    wq = _orthogonal(k0, hd_q, d_model, gain)          # PyTorch (out, in) layout
    wk = _orthogonal(k1, hd_q, d_model, gain)
    wv = _orthogonal(k2, hd_v, d_model, gain)
    bound = 1.0 / np.sqrt(hd_v)                        # default nn.Linear init
    wo = jax.random.uniform(k3, (d_model, hd_v), jnp.float32, -bound, bound)
    return {
        "wq": wq, "wk": wk, "wv": wv, "wo": wo,
        "g_emb": jnp.ones((hd_q,), jnp.float32),
        "b_emb": jnp.zeros((hd_q,), jnp.float32),
        "g_out": jnp.ones((d_model,), jnp.float32),
        "b_out": jnp.zeros((d_model,), jnp.float32),
    }


def reference(x, params, *, n_heads, d_q, d_v):
    """Pure-JAX (f32) reference mirroring the PyTorch forward."""
    B, N, d_model = x.shape
    xf = x.reshape(-1, d_model)

    def ln(y, g, b, eps=1e-6):
        mu = y.mean(-1, keepdims=True)
        var = ((y - mu) ** 2).mean(-1, keepdims=True)
        return (y - mu) / jnp.sqrt(var + eps) * g + b

    q = ln(xf @ params["wq"].T, params["g_emb"], params["b_emb"]).reshape(B, N, n_heads, d_q)
    k = ln(xf @ params["wk"].T, params["g_emb"], params["b_emb"]).reshape(B, N, n_heads, d_q)
    v = ln(xf @ params["wv"].T, params["g_emb"], params["b_emb"]).reshape(B, N, n_heads, d_v)
    q, k, v = (jnp.transpose(t, (0, 2, 1, 3)) for t in (q, k, v))
    s = jnp.einsum('bhnd,bhmd->bhnm', q, k) / np.sqrt(d_q)
    w = jax.nn.softmax(s, axis=-1)
    nv = jnp.einsum('bhnm,bhmd->bhnd', w, v)
    nv = jnp.transpose(nv, (0, 2, 1, 3)).reshape(B * N, n_heads * d_v)
    out = nv @ params["wo"].T + xf
    out = ln(out, params["g_out"], params["b_out"])
    return out.reshape(B, N, d_model)


if __name__ == "__main__":
    d_model, d_kq, d_v, n_heads = 32, 8, 8, 4
    B, N = 4, 8

    key = jax.random.PRNGKey(0)
    kx, kp = jax.random.split(key)
    x = jax.random.normal(kx, (B, N, d_model), dtype=jnp.float32)
    params = make_params(kp, d_model, d_kq, d_v, n_heads)

    out = multi_head_attention(x, params, n_heads=n_heads, d_q=d_kq, d_v=d_v)
    out = jax.block_until_ready(out)

    ref = reference(x, params, n_heads=n_heads, d_q=d_kq, d_v=d_v)
    # Tolerance covers bf16 MXU operands in the two projections (attention,
    # softmax and LayerNorm statistics are all f32 inside the kernel).
    np.testing.assert_allclose(np.asarray(out), np.asarray(ref),
                               rtol=5e-2, atol=5e-2)
    print("KERNEL_OK")
</pallas_src>

<mosaic_0001>
module attributes {stable_mosaic.version = 11 : i64} {
  func.func @mha_kernel(%arg0: i32, %arg1: memref<2x8x32xf32, #tpu.memory_space<vmem>>, %arg2: memref<32x96xbf16, #tpu.memory_space<vmem>>, %arg3: memref<32x32xbf16, #tpu.memory_space<vmem>>, %arg4: memref<1x32xf32, #tpu.memory_space<vmem>>, %arg5: memref<1x32xf32, #tpu.memory_space<vmem>>, %arg6: memref<1x32xf32, #tpu.memory_space<vmem>>, %arg7: memref<1x32xf32, #tpu.memory_space<vmem>>, %arg8: memref<2x8x32xf32, #tpu.memory_space<vmem>>) attributes {dimension_semantics = [#tpu.dimension_semantics<parallel>], iteration_bounds = array<i64: 2>, scalar_prefetch = 0 : i64, scratch_operands = 0 : i64, tpu.core_type = #tpu.core_type<tc>, window_params = [{transform_indices = @transform_0, window_bounds = array<i64: 2, 8, 32>}, {pipeline_mode = #tpu.pipeline_mode<synchronous>, transform_indices = @transform_1, window_bounds = array<i64: 32, 96>}, {pipeline_mode = #tpu.pipeline_mode<synchronous>, transform_indices = @transform_2, window_bounds = array<i64: 32, 32>}, {pipeline_mode = #tpu.pipeline_mode<synchronous>, transform_indices = @transform_3, window_bounds = array<i64: 1, 32>}, {pipeline_mode = #tpu.pipeline_mode<synchronous>, transform_indices = @transform_4, window_bounds = array<i64: 1, 32>}, {pipeline_mode = #tpu.pipeline_mode<synchronous>, transform_indices = @transform_5, window_bounds = array<i64: 1, 32>}, {pipeline_mode = #tpu.pipeline_mode<synchronous>, transform_indices = @transform_6, window_bounds = array<i64: 1, 32>}, {transform_indices = @transform_7, window_bounds = array<i64: 2, 8, 32>}]} {
    %c0 = arith.constant 0 : index
    %c0_0 = arith.constant 0 : index
    %c0_1 = arith.constant 0 : index
    %0 = vector.load %arg1[%c0, %c0_0, %c0_1] : memref<2x8x32xf32, #tpu.memory_space<vmem>>, vector<2x8x32xf32>
    %1 = vector.shape_cast %0 : vector<2x8x32xf32> to vector<16x32xf32>
    %2 = arith.truncf %1 : vector<16x32xf32> to vector<16x32xbf16>
    %c0_2 = arith.constant 0 : index
    %c0_3 = arith.constant 0 : index
    %3 = vector.load %arg2[%c0_2, %c0_3] : memref<32x96xbf16, #tpu.memory_space<vmem>>, vector<32x96xbf16>
    %cst = arith.constant dense<0.000000e+00> : vector<16x96xf32>
    %4 = tpu.matmul %2, %3, %cst {dimension_numbers = #tpu.dot_dimension_numbers<[1], [0], [0], [1], [0, 0, 1, 1], [], []>} : vector<16x32xbf16>, vector<32x96xbf16>, vector<16x96xf32> -> vector<16x96xf32>
    %c0_4 = arith.constant 0 : index
    %c0_5 = arith.constant 0 : index
    %5 = vector.load %arg4[%c0_4, %c0_5] : memref<1x32xf32, #tpu.memory_space<vmem>>, vector<1x32xf32>
    %c0_6 = arith.constant 0 : index
    %c0_7 = arith.constant 0 : index
    %6 = vector.load %arg5[%c0_6, %c0_7] : memref<1x32xf32, #tpu.memory_space<vmem>>, vector<1x32xf32>
    %7 = vector.extract_strided_slice %4 {offsets = [0, 0], sizes = [16, 32], strides = [1, 1]} : vector<16x96xf32> to vector<16x32xf32>
    %cst_8 = arith.constant dense<0.000000e+00> : vector<16xf32>
    %8 = vector.multi_reduction <add>, %7, %cst_8 [1] : vector<16x32xf32> to vector<16xf32>
    %9 = vector.shape_cast %8 : vector<16xf32> to vector<16x1xf32>
    %cst_9 = arith.constant 3.200000e+01 : f32
    %10 = vector.broadcast %cst_9 : f32 to vector<16x1xf32>
    %11 = arith.divf %9, %10 : vector<16x1xf32>
    %12 = vector.broadcast %11 : vector<16x1xf32> to vector<16x32xf32>
    %13 = arith.subf %7, %12 : vector<16x32xf32>
    %14 = arith.mulf %13, %13 : vector<16x32xf32>
    %cst_10 = arith.constant dense<0.000000e+00> : vector<16xf32>
    %15 = vector.multi_reduction <add>, %14, %cst_10 [1] : vector<16x32xf32> to vector<16xf32>
    %16 = vector.shape_cast %15 : vector<16xf32> to vector<16x1xf32>
    %cst_11 = arith.constant 3.200000e+01 : f32
    %17 = vector.broadcast %cst_11 : f32 to vector<16x1xf32>
    %18 = arith.divf %16, %17 : vector<16x1xf32>
    %19 = vector.broadcast %11 : vector<16x1xf32> to vector<16x32xf32>
    %20 = arith.subf %7, %19 : vector<16x32xf32>
    %cst_12 = arith.constant 9.99999997E-7 : f32
    %21 = vector.broadcast %cst_12 : f32 to vector<16x1xf32>
    %22 = arith.addf %18, %21 : vector<16x1xf32>
    %23 = math.rsqrt %22 : vector<16x1xf32>
    %24 = vector.broadcast %23 : vector<16x1xf32> to vector<16x32xf32>
    %25 = arith.mulf %20, %24 : vector<16x32xf32>
    %26 = vector.broadcast %5 : vector<1x32xf32> to vector<16x32xf32>
    %27 = arith.mulf %25, %26 : vector<16x32xf32>
    %28 = vector.broadcast %6 : vector<1x32xf32> to vector<16x32xf32>
    %29 = arith.addf %27, %28 : vector<16x32xf32>
    %30 = vector.extract_strided_slice %4 {offsets = [0, 32], sizes = [16, 32], strides = [1, 1]} : vector<16x96xf32> to vector<16x32xf32>
    %cst_13 = arith.constant dense<0.000000e+00> : vector<16xf32>
    %31 = vector.multi_reduction <add>, %30, %cst_13 [1] : vector<16x32xf32> to vector<16xf32>
    %32 = vector.shape_cast %31 : vector<16xf32> to vector<16x1xf32>
    %cst_14 = arith.constant 3.200000e+01 : f32
    %33 = vector.broadcast %cst_14 : f32 to vector<16x1xf32>
    %34 = arith.divf %32, %33 : vector<16x1xf32>
    %35 = vector.broadcast %34 : vector<16x1xf32> to vector<16x32xf32>
    %36 = arith.subf %30, %35 : vector<16x32xf32>
    %37 = arith.mulf %36, %36 : vector<16x32xf32>
    %cst_15 = arith.constant dense<0.000000e+00> : vector<16xf32>
    %38 = vector.multi_reduction <add>, %37, %cst_15 [1] : vector<16x32xf32> to vector<16xf32>
    %39 = vector.shape_cast %38 : vector<16xf32> to vector<16x1xf32>
    %cst_16 = arith.constant 3.200000e+01 : f32
    %40 = vector.broadcast %cst_16 : f32 to vector<16x1xf32>
    %41 = arith.divf %39, %40 : vector<16x1xf32>
    %42 = vector.broadcast %34 : vector<16x1xf32> to vector<16x32xf32>
    %43 = arith.subf %30, %42 : vector<16x32xf32>
    %cst_17 = arith.constant 9.99999997E-7 : f32
    %44 = vector.broadcast %cst_17 : f32 to vector<16x1xf32>
    %45 = arith.addf %41, %44 : vector<16x1xf32>
    %46 = math.rsqrt %45 : vector<16x1xf32>
    %47 = vector.broadcast %46 : vector<16x1xf32> to vector<16x32xf32>
    %48 = arith.mulf %43, %47 : vector<16x32xf32>
    %49 = vector.broadcast %5 : vector<1x32xf32> to vector<16x32xf32>
    %50 = arith.mulf %48, %49 : vector<16x32xf32>
    %51 = vector.broadcast %6 : vector<1x32xf32> to vector<16x32xf32>
    %52 = arith.addf %50, %51 : vector<16x32xf32>
    %53 = vector.extract_strided_slice %4 {offsets = [0, 64], sizes = [16, 32], strides = [1, 1]} : vector<16x96xf32> to vector<16x32xf32>
    %cst_18 = arith.constant dense<0.000000e+00> : vector<16xf32>
    %54 = vector.multi_reduction <add>, %53, %cst_18 [1] : vector<16x32xf32> to vector<16xf32>
    %55 = vector.shape_cast %54 : vector<16xf32> to vector<16x1xf32>
    %cst_19 = arith.constant 3.200000e+01 : f32
    %56 = vector.broadcast %cst_19 : f32 to vector<16x1xf32>
    %57 = arith.divf %55, %56 : vector<16x1xf32>
    %58 = vector.broadcast %57 : vector<16x1xf32> to vector<16x32xf32>
    %59 = arith.subf %53, %58 : vector<16x32xf32>
    %60 = arith.mulf %59, %59 : vector<16x32xf32>
    %cst_20 = arith.constant dense<0.000000e+00> : vector<16xf32>
    %61 = vector.multi_reduction <add>, %60, %cst_20 [1] : vector<16x32xf32> to vector<16xf32>
    %62 = vector.shape_cast %61 : vector<16xf32> to vector<16x1xf32>
    %cst_21 = arith.constant 3.200000e+01 : f32
    %63 = vector.broadcast %cst_21 : f32 to vector<16x1xf32>
    %64 = arith.divf %62, %63 : vector<16x1xf32>
    %65 = vector.broadcast %57 : vector<16x1xf32> to vector<16x32xf32>
    %66 = arith.subf %53, %65 : vector<16x32xf32>
    %cst_22 = arith.constant 9.99999997E-7 : f32
    %67 = vector.broadcast %cst_22 : f32 to vector<16x1xf32>
    %68 = arith.addf %64, %67 : vector<16x1xf32>
    %69 = math.rsqrt %68 : vector<16x1xf32>
    %70 = vector.broadcast %69 : vector<16x1xf32> to vector<16x32xf32>
    %71 = arith.mulf %66, %70 : vector<16x32xf32>
    %72 = vector.broadcast %5 : vector<1x32xf32> to vector<16x32xf32>
    %73 = arith.mulf %71, %72 : vector<16x32xf32>
    %74 = vector.broadcast %6 : vector<1x32xf32> to vector<16x32xf32>
    %75 = arith.addf %73, %74 : vector<16x32xf32>
    %cst_23 = arith.constant 0.353553385 : f32
    %76 = vector.broadcast %cst_23 : f32 to vector<16x32xf32>
    %77 = arith.mulf %29, %76 : vector<16x32xf32>
    %78 = vector.extract_strided_slice %77 {offsets = [0, 0], sizes = [16, 8], strides = [1, 1]} : vector<16x32xf32> to vector<16x8xf32>
    %79 = vector.extract_strided_slice %77 {offsets = [0, 8], sizes = [16, 8], strides = [1, 1]} : vector<16x32xf32> to vector<16x8xf32>
    %80 = vector.extract_strided_slice %77 {offsets = [0, 16], sizes = [16, 8], strides = [1, 1]} : vector<16x32xf32> to vector<16x8xf32>
    %81 = vector.extract_strided_slice %77 {offsets = [0, 24], sizes = [16, 8], strides = [1, 1]} : vector<16x32xf32> to vector<16x8xf32>
    %82 = vector.shape_cast %78 : vector<16x8xf32> to vector<1x16x8xf32>
    %83 = vector.shape_cast %79 : vector<16x8xf32> to vector<1x16x8xf32>
    %84 = vector.shape_cast %80 : vector<16x8xf32> to vector<1x16x8xf32>
    %85 = vector.shape_cast %81 : vector<16x8xf32> to vector<1x16x8xf32>
    %86 = tpu.concatenate %82, %83, %84, %85 in 0 : vector<1x16x8xf32>, vector<1x16x8xf32>, vector<1x16x8xf32>, vector<1x16x8xf32> -> vector<4x16x8xf32>
    %87 = vector.shape_cast %86 : vector<4x16x8xf32> to vector<8x8x8xf32>
    %88 = vector.extract_strided_slice %52 {offsets = [0, 0], sizes = [16, 8], strides = [1, 1]} : vector<16x32xf32> to vector<16x8xf32>
    %89 = vector.extract_strided_slice %52 {offsets = [0, 8], sizes = [16, 8], strides = [1, 1]} : vector<16x32xf32> to vector<16x8xf32>
    %90 = vector.extract_strided_slice %52 {offsets = [0, 16], sizes = [16, 8], strides = [1, 1]} : vector<16x32xf32> to vector<16x8xf32>
    %91 = vector.extract_strided_slice %52 {offsets = [0, 24], sizes = [16, 8], strides = [1, 1]} : vector<16x32xf32> to vector<16x8xf32>
    %92 = vector.shape_cast %88 : vector<16x8xf32> to vector<1x16x8xf32>
    %93 = vector.shape_cast %89 : vector<16x8xf32> to vector<1x16x8xf32>
    %94 = vector.shape_cast %90 : vector<16x8xf32> to vector<1x16x8xf32>
    %95 = vector.shape_cast %91 : vector<16x8xf32> to vector<1x16x8xf32>
    %96 = tpu.concatenate %92, %93, %94, %95 in 0 : vector<1x16x8xf32>, vector<1x16x8xf32>, vector<1x16x8xf32>, vector<1x16x8xf32> -> vector<4x16x8xf32>
    %97 = vector.shape_cast %96 : vector<4x16x8xf32> to vector<8x8x8xf32>
    %98 = vector.extract_strided_slice %75 {offsets = [0, 0], sizes = [16, 8], strides = [1, 1]} : vector<16x32xf32> to vector<16x8xf32>
    %99 = vector.extract_strided_slice %75 {offsets = [0, 8], sizes = [16, 8], strides = [1, 1]} : vector<16x32xf32> to vector<16x8xf32>
    %100 = vector.extract_strided_slice %75 {offsets = [0, 16], sizes = [16, 8], strides = [1, 1]} : vector<16x32xf32> to vector<16x8xf32>
    %101 = vector.extract_strided_slice %75 {offsets = [0, 24], sizes = [16, 8], strides = [1, 1]} : vector<16x32xf32> to vector<16x8xf32>
    %102 = vector.shape_cast %98 : vector<16x8xf32> to vector<1x16x8xf32>
    %103 = vector.shape_cast %99 : vector<16x8xf32> to vector<1x16x8xf32>
    %104 = vector.shape_cast %100 : vector<16x8xf32> to vector<1x16x8xf32>
    %105 = vector.shape_cast %101 : vector<16x8xf32> to vector<1x16x8xf32>
    %106 = tpu.concatenate %102, %103, %104, %105 in 0 : vector<1x16x8xf32>, vector<1x16x8xf32>, vector<1x16x8xf32>, vector<1x16x8xf32> -> vector<4x16x8xf32>
    %107 = vector.shape_cast %106 : vector<4x16x8xf32> to vector<8x8x8xf32>
    "tpu.trace_start"() <{level = 10 : i32, message = "gnd,gmd->gnm"}> : () -> ()
    %cst_24 = arith.constant dense<0.000000e+00> : vector<8x8x8xf32>
    %108 = tpu.matmul %87, %97, %cst_24 {dimension_numbers = #tpu.dot_dimension_numbers<[2], [2], [1], [1], [0, 0, 0, 1, 1, 1], [0], [0]>} : vector<8x8x8xf32>, vector<8x8x8xf32>, vector<8x8x8xf32> -> vector<8x8x8xf32>
    "tpu.trace_stop"() : () -> ()
    %cst_25 = arith.constant dense<0xFF800000> : vector<8x8xf32>
    %109 = vector.multi_reduction <maximumf>, %108, %cst_25 [2] : vector<8x8x8xf32> to vector<8x8xf32>
    %110 = vector.shape_cast %109 : vector<8x8xf32> to vector<8x8x1xf32>
    %111 = vector.broadcast %110 : vector<8x8x1xf32> to vector<8x8x8xf32>
    %112 = arith.subf %108, %111 : vector<8x8x8xf32>
    %113 = math.exp %112 : vector<8x8x8xf32>
    "tpu.trace_start"() <{level = 10 : i32, message = "gnm,gmd->gnd"}> : () -> ()
    %cst_26 = arith.constant dense<0.000000e+00> : vector<8x8x8xf32>
    %114 = tpu.matmul %113, %107, %cst_26 {dimension_numbers = #tpu.dot_dimension_numbers<[2], [1], [1], [2], [0, 0, 0, 1, 1, 2], [0], [0]>} : vector<8x8x8xf32>, vector<8x8x8xf32>, vector<8x8x8xf32> -> vector<8x8x8xf32>
    "tpu.trace_stop"() : () -> ()
    %cst_27 = arith.constant dense<0.000000e+00> : vector<8x8xf32>
    %115 = vector.multi_reduction <add>, %113, %cst_27 [2] : vector<8x8x8xf32> to vector<8x8xf32>
    %116 = vector.shape_cast %115 : vector<8x8xf32> to vector<8x8x1xf32>
    %117 = tpu.reciprocal %116 {approx = true} : vector<8x8x1xf32> -> vector<8x8x1xf32>
    %118 = vector.broadcast %117 : vector<8x8x1xf32> to vector<8x8x8xf32>
    %119 = arith.mulf %114, %118 : vector<8x8x8xf32>
    %120 = vector.shape_cast %119 : vector<8x8x8xf32> to vector<4x16x8xf32>
    %121 = vector.extract_strided_slice %120 {offsets = [0, 0, 0], sizes = [1, 16, 8], strides = [1, 1, 1]} : vector<4x16x8xf32> to vector<1x16x8xf32>
    %122 = vector.shape_cast %121 : vector<1x16x8xf32> to vector<16x8xf32>
    %123 = vector.extract_strided_slice %120 {offsets = [1, 0, 0], sizes = [1, 16, 8], strides = [1, 1, 1]} : vector<4x16x8xf32> to vector<1x16x8xf32>
    %124 = vector.shape_cast %123 : vector<1x16x8xf32> to vector<16x8xf32>
    %125 = vector.extract_strided_slice %120 {offsets = [2, 0, 0], sizes = [1, 16, 8], strides = [1, 1, 1]} : vector<4x16x8xf32> to vector<1x16x8xf32>
    %126 = vector.shape_cast %125 : vector<1x16x8xf32> to vector<16x8xf32>
    %127 = vector.extract_strided_slice %120 {offsets = [3, 0, 0], sizes = [1, 16, 8], strides = [1, 1, 1]} : vector<4x16x8xf32> to vector<1x16x8xf32>
    %128 = vector.shape_cast %127 : vector<1x16x8xf32> to vector<16x8xf32>
    %129 = tpu.concatenate %122, %124, %126, %128 in 1 : vector<16x8xf32>, vector<16x8xf32>, vector<16x8xf32>, vector<16x8xf32> -> vector<16x32xf32>
    %130 = arith.truncf %129 : vector<16x32xf32> to vector<16x32xbf16>
    %c0_28 = arith.constant 0 : index
    %c0_29 = arith.constant 0 : index
    %131 = vector.load %arg3[%c0_28, %c0_29] : memref<32x32xbf16, #tpu.memory_space<vmem>>, vector<32x32xbf16>
    %cst_30 = arith.constant dense<0.000000e+00> : vector<16x32xf32>
    %132 = tpu.matmul %130, %131, %cst_30 {dimension_numbers = #tpu.dot_dimension_numbers<[1], [0], [0], [1], [0, 0, 1, 1], [], []>} : vector<16x32xbf16>, vector<32x32xbf16>, vector<16x32xf32> -> vector<16x32xf32>
    %133 = arith.addf %132, %1 : vector<16x32xf32>
    %c0_31 = arith.constant 0 : index
    %c0_32 = arith.constant 0 : index
    %134 = vector.load %arg6[%c0_31, %c0_32] : memref<1x32xf32, #tpu.memory_space<vmem>>, vector<1x32xf32>
    %c0_33 = arith.constant 0 : index
    %c0_34 = arith.constant 0 : index
    %135 = vector.load %arg7[%c0_33, %c0_34] : memref<1x32xf32, #tpu.memory_space<vmem>>, vector<1x32xf32>
    %cst_35 = arith.constant dense<0.000000e+00> : vector<16xf32>
    %136 = vector.multi_reduction <add>, %133, %cst_35 [1] : vector<16x32xf32> to vector<16xf32>
    %137 = vector.shape_cast %136 : vector<16xf32> to vector<16x1xf32>
    %cst_36 = arith.constant 3.200000e+01 : f32
    %138 = vector.broadcast %cst_36 : f32 to vector<16x1xf32>
    %139 = arith.divf %137, %138 : vector<16x1xf32>
    %140 = vector.broadcast %139 : vector<16x1xf32> to vector<16x32xf32>
    %141 = arith.subf %133, %140 : vector<16x32xf32>
    %142 = arith.mulf %141, %141 : vector<16x32xf32>
    %cst_37 = arith.constant dense<0.000000e+00> : vector<16xf32>
    %143 = vector.multi_reduction <add>, %142, %cst_37 [1] : vector<16x32xf32> to vector<16xf32>
    %144 = vector.shape_cast %143 : vector<16xf32> to vector<16x1xf32>
    %cst_38 = arith.constant 3.200000e+01 : f32
    %145 = vector.broadcast %cst_38 : f32 to vector<16x1xf32>
    %146 = arith.divf %144, %145 : vector<16x1xf32>
    %147 = vector.broadcast %139 : vector<16x1xf32> to vector<16x32xf32>
    %148 = arith.subf %133, %147 : vector<16x32xf32>
    %cst_39 = arith.constant 9.99999997E-7 : f32
    %149 = vector.broadcast %cst_39 : f32 to vector<16x1xf32>
    %150 = arith.addf %146, %149 : vector<16x1xf32>
    %151 = math.rsqrt %150 : vector<16x1xf32>
    %152 = vector.broadcast %151 : vector<16x1xf32> to vector<16x32xf32>
    %153 = arith.mulf %148, %152 : vector<16x32xf32>
    %154 = vector.broadcast %134 : vector<1x32xf32> to vector<16x32xf32>
    %155 = arith.mulf %153, %154 : vector<16x32xf32>
    %156 = vector.broadcast %135 : vector<1x32xf32> to vector<16x32xf32>
    %157 = arith.addf %155, %156 : vector<16x32xf32>
    %158 = vector.shape_cast %157 : vector<16x32xf32> to vector<2x8x32xf32>
    %c0_40 = arith.constant 0 : index
    %c0_41 = arith.constant 0 : index
    %c0_42 = arith.constant 0 : index
    %159 = vector.load %arg8[%c0_40, %c0_41, %c0_42] : memref<2x8x32xf32, #tpu.memory_space<vmem>>, vector<2x8x32xf32>
    tpu.vector_store %arg8[%c0_40, %c0_41, %c0_42], %158 {strides = array<i32>} : memref<2x8x32xf32, #tpu.memory_space<vmem>>, vector<2x8x32xf32>,
    return
  }
  func.func @transform_0(%arg0: i32) -> (i32, i32, i32) {
    %c0_i32 = arith.constant 0 : i32
    %c0_i32_0 = arith.constant 0 : i32
    %c0_i32_1 = arith.constant 0 : i32
    return %arg0, %c0_i32, %c0_i32_0 : i32, i32, i32
  }
  func.func @transform_1(%arg0: i32) -> (i32, i32) {
    %c0_i32 = arith.constant 0 : i32
    %c0_i32_0 = arith.constant 0 : i32
    %c0_i32_1 = arith.constant 0 : i32
    return %c0_i32, %c0_i32_0 : i32, i32
  }
  func.func @transform_2(%arg0: i32) -> (i32, i32) {
    %c0_i32 = arith.constant 0 : i32
    %c0_i32_0 = arith.constant 0 : i32
    %c0_i32_1 = arith.constant 0 : i32
    return %c0_i32, %c0_i32_0 : i32, i32
  }
  func.func @transform_3(%arg0: i32) -> (i32, i32) {
    %c0_i32 = arith.constant 0 : i32
    %c0_i32_0 = arith.constant 0 : i32
    %c0_i32_1 = arith.constant 0 : i32
    return %c0_i32, %c0_i32_0 : i32, i32
  }
  func.func @transform_4(%arg0: i32) -> (i32, i32) {
    %c0_i32 = arith.constant 0 : i32
    %c0_i32_0 = arith.constant 0 : i32
    %c0_i32_1 = arith.constant 0 : i32
    return %c0_i32, %c0_i32_0 : i32, i32
  }
  func.func @transform_5(%arg0: i32) -> (i32, i32) {
    %c0_i32 = arith.constant 0 : i32
    %c0_i32_0 = arith.constant 0 : i32
    %c0_i32_1 = arith.constant 0 : i32
    return %c0_i32, %c0_i32_0 : i32, i32
  }
  func.func @transform_6(%arg0: i32) -> (i32, i32) {
    %c0_i32 = arith.constant 0 : i32
    %c0_i32_0 = arith.constant 0 : i32
    %c0_i32_1 = arith.constant 0 : i32
    return %c0_i32, %c0_i32_0 : i32, i32
  }
  func.func @transform_7(%arg0: i32) -> (i32, i32, i32) {
    %c0_i32 = arith.constant 0 : i32
    %c0_i32_0 = arith.constant 0 : i32
    %c0_i32_1 = arith.constant 0 : i32
    return %arg0, %c0_i32, %c0_i32_0 : i32, i32, i32
  }
}

</mosaic_0001>

<bundles_post_ra>
// kernel: tpu_custom_call.1
= control target key start
LH: loop header
LB: loop body
LE: loop exit
PB: predicated region body
PF: predicated region fallthrough
CT: control target
= control target key end

     0   :  { %12 = vsyncpa [#allocation3], 0  ;;  %s3172_s0 = inlined_call_operand.hbm [shape: f32[4,8,32], index: 0, kind: input, shape index: {}]   ;;  %s3173_s1 = inlined_call_operand.hbm [shape: bf16[32,96], index: 1, kind: input, shape index: {}]   ;;  %s3174_s2 = inlined_call_operand.hbm [shape: bf16[32,32], index: 2, kind: input, shape index: {}]   ;;  %s3175_s3 = inlined_call_operand.vmem [shape: f32[1,32], index: 3, kind: input, shape index: {}]   ;;  %s3176_s4 = inlined_call_operand.vmem [shape: f32[1,32], index: 4, kind: input, shape index: {}]   ;;  %s3177_s5 = inlined_call_operand.vmem [shape: f32[1,32], index: 5, kind: input, shape index: {}]   ;;  %s3178_s6 = inlined_call_operand.vmem [shape: f32[1,32], index: 6, kind: input, shape index: {}]   ;;  %s3179_s7 = inlined_call_operand.hbm [shape: f32[4,8,32], index: 7, kind: output, shape index: {}]  }
   0x1   :  { %14 = vsyncpa [#allocation3 + $0x1], 0 }
   0x2   :  { %15 = vsyncpa [#allocation6], 0 }
   0x3   :  { %16 = vsyncpa [#allocation4], 0 }
   0x4   :  { %18 = vsyncpa [#allocation4 + $0x1], 0  ;;  %s2690_s24 = smov 0   ;;  %s2692_s25 = smov 0  }
   0x5   :  { %s2694_s26 = smov 0   ;;  %s2696_s27 = smov 0  }
   0x6 LB: > { %s2711_s28 = sadd.s32 4294967295, %s2628_s27   ;;  %s2134_s29 = sadd.s32 4294967294, %s2628_s27   ;;  %s2628_s27 = sphi %s2696_s27, %s3199_s27   ;;  %s2624_s26 = sphi %s2694_s26, %s3198_s26   ;;  %s2620_s25 = sphi %s2692_s25, %s3197_s25   ;;  %s2616_s24 = sphi %s2690_s24, %s3196_s24  }
   0x7   : > { %p44_p0 = scmp.ne.s32.totalorder %s2620_s25, %s2616_s24  ;;  %p3180_p1 = scmp.eq.s32.totalorder %s2711_s28, 0 }
   0x8   : > { %p200_p3 = scmp.eq.s32.totalorder %s2134_s29, 1  ;;  %p2135_p5 = scmp.ge.s32.totalorder %s2628_s27, 1 }
   0x9   : > { %p2720_p4 = por %p3180_p1, %p44_p0  ;;  %p207_p7 = scmp.lt.s32.totalorder %s2628_s27, 3 }
   0xa   : > { %p2725_p6 = por %p200_p3, %p44_p0  ;;  %s2630_s10 = smov [#allocation5]  }
   0xb   : > { %s3183_s30 = scalar_select %p2720_p4, 1, 0 }
   0xc   : > { %s3184_s8 = scalar_select %p2725_p6, 1, 0 }
   0xd   : > { %p2730_p8 = pnand %p2135_p5, %p207_p7  ;;  %s219_s11 = sshll.u32 %s2630_s10, 4  ;;  %s2734_s11 = int_to_ptr.vmem [resolvable:$true] %s219_s11 }
   0xe   : > { %s2631_s13 = smov [#allocation7]   ;;  %s2472_s17 = scalar_lea.hbm %s3173_s1, 256 }
   0xf   : > { %p2334_p9 = pneg %p2730_p8  ;;  %s232_s14 = sshll.u32 %s2631_s13, 4  ;;  %s2745_s14 = int_to_ptr.vmem [resolvable:$true] %s232_s14 }
  0x10   : > { %p2473_p12 = scmp.ne.s32.totalorder %s3173_s1, %s2472_s17  ;;  %p2479_p5 = scmp.lt.u32.totalorder %s2472_s17, %s3173_s1 }
  0x11   : > { %p2741_p11 = pnand %p2334_p9, %p3180_p1 }
  0x13   : > { %p2474_p13 = pneg %p2741_p11 }
  0x15   : > { %p2475_p0 = pnand %p2474_p13, %p2473_p12 }
  0x17   : > { %p2476_p3 = pneg %p2475_p0 }
  0x19   : > { %p2481_p7 = pnand %p2479_p5, %p2476_p3 }
  0x1b   : > { %2484 = shalt.err (!%p2481_p7)
}
  0x1c   : > { %s2485_s22 = scalar_lea.vmem %s2734_s11, 256  ;;  %p2493_p2 = scmp.lt.s32.totalorder %s2734_s11, %s2734_s11 }
  0x1d   : > { %p2486_p9 = scmp.ne.s32.totalorder %s2734_s11, %s2485_s22  ;;  %p2494_p12 = scmp.lt.s32.totalorder %s2485_s22, %s2485_s22 }
  0x1f   : > { %p2488_p10 = pnand %p2486_p9, %p2474_p13  ;;  %p2495_p0 = por %p2494_p12, %p2493_p2 }
  0x21   : > { %p2489_p1 = pneg %p2488_p10 }
  0x23   : > { %p2496_p6 = pnand %p2495_p0, %p2489_p1 }
  0x25   : > { %2499 = shalt.err (!%p2496_p6)
}
  0x26   : > { %s2632_s23 = smov 64   ;;  %s2633_s29 = smov 4  }
  0x27   : > { %2337 = dma.hbm_to_vmem [thread:$0]  (!%p2741_p11), %s3173_s1, 256, %s2734_s11, [#allocation6], %s2632_s23, %s2632_s23, %s2633_s29  }
  0x28   : > { %s2500_s17 = scalar_lea.hbm %s3174_s2, 256 }
  0x29   : > { %p2501_p2 = scmp.ne.s32.totalorder %s3174_s2, %s2500_s17  ;;  %p2507_p10 = scmp.lt.u32.totalorder %s2500_s17, %s3174_s2 }
  0x2b   : > { %p2503_p1 = pnand %p2501_p2, %p2474_p13 }
  0x2d   : > { %p2504_p6 = pneg %p2503_p1 }
  0x2f   : > { %p2509_p3 = pnand %p2507_p10, %p2504_p6 }
  0x31   : > { %2512 = shalt.err (!%p2509_p3)
}
  0x32   : > { %s2513_s11 = scalar_lea.vmem %s2745_s14, 256  ;;  %p2521_p12 = scmp.lt.s32.totalorder %s2745_s14, %s2745_s14 }
  0x33   : > { %p2514_p5 = scmp.ne.s32.totalorder %s2745_s14, %s2513_s11  ;;  %p2522_p0 = scmp.lt.s32.totalorder %s2513_s11, %s2513_s11 }
  0x35   : > { %p2516_p7 = pnand %p2514_p5, %p2474_p13  ;;  %p2523_p2 = por %p2522_p0, %p2521_p12 }
  0x37   : > { %p2517_p9 = pneg %p2516_p7 }
  0x39   : > { %p2524_p1 = pnand %p2523_p2, %p2517_p9 }
  0x3b   : > { %2527 = shalt.err (!%p2524_p1)
}
  0x3c   : > { %2340 = dma.hbm_to_vmem [thread:$0]  (!%p2741_p11), %s3174_s2, 256, %s2745_s14, [#allocation6], %s2632_s23, %s2632_s23, %s2633_s29  }
  0x3d   : > { %s2800_s13 = sadd.s32 1, %s2628_s27   ;;  %s31_s12 = sadd.s32 1, %s2624_s26 }
  0x3e   : > { %s28_s15 = ssub.s32 %s2628_s27, %s2800_s13  ;;  %p38_p13 = scmp.ne.s32.totalorder %s2624_s26, %s2620_s25 }
  0x3f   : > { %p29_p6 = scmp.eq.s32.totalorder %s28_s15, 0  ;;  %p39_p10 = scmp.eq.s32.totalorder %s2628_s27, 0 }
  0x40   : > { %p3187_p3 = scmp.eq.s32.totalorder %s2711_s28, 1  ;;  %p2351_p7 = scmp.lt.s32.totalorder %s2628_s27, 2 }
  0x41   : > { %s2816_s17 = scalar_select %p29_p6, %s2624_s26, %s31_s12  }
  0x42   : > { %p2810_p5 = por %p3187_p3, %p38_p13  ;;  %p40_p9 = por %p39_p10, %p38_p13 }
  0x43   : > { %s258_s18 = sand.u32 1, %s2624_s26   ;;  %s2186_s14 = sshll.u32 %s2628_s27, 8 }
  0x44   : > { %s3188_s16 = scalar_select %p2810_p5, 1, 0 }
  0x45   : > { %s2139_s19 = sshll.u32 %s258_s18, 4  ;;  %s2823_s20 = scalar_lea.hbm %s3172_s0, %s2186_s14 }
  0x46   : > { %s262_s21 = scalar_lea.vmem [#allocation2], %s2139_s19  ;;  %p2827_p11 = pnand %p2351_p7, %p40_p9 }
  0x47   : > { %s269_s11 = sshll.u32 %s262_s21, 4  ;;  %s2831_s10 = scalar_lea.sflag [#allocation3], %s258_s18  ;;  %s2825_s11 = int_to_ptr.vmem [resolvable:$true] %s269_s11 }
  0x48   : > { %s2528_s12 = scalar_lea.hbm %s2823_s20, 256  ;;  %p2530_p0 = pneg %p2827_p11 }
  0x49   : > { %p2529_p12 = scmp.ne.s32.totalorder %s2823_s20, %s2528_s12  ;;  %s2533_s14 = scalar_lea.hbm %s3172_s0, 512 }
  0x4a   : > { %p2534_p13 = scmp.lt.u32.totalorder %s2823_s20, %s3172_s0  ;;  %p2535_p6 = scmp.lt.u32.totalorder %s2533_s14, %s2528_s12 }
  0x4b   : > { %p2531_p2 = pnand %p2530_p0, %p2529_p12  ;;  %p2537_p3 = scmp.lt.u32.totalorder %s2528_s12, %s2823_s20 }
  0x4c   : > { %p2536_p10 = por %p2535_p6, %p2534_p13 }
  0x4d   : > { %p2532_p1 = pneg %p2531_p2 }
  0x4e   : > { %p2538_p7 = por %p2537_p3, %p2536_p10 }
  0x50   : > { %p2539_p9 = pnand %p2538_p7, %p2532_p1 }
  0x52   : > { %2542 = shalt.err (!%p2539_p9)
}
  0x53   : > { %s2543_s18 = scalar_lea.vmem %s2825_s11, 256  ;;  %s2634_s21 = smov [#allocation2]  }
  0x54   : > { %p2544_p12 = scmp.ne.s32.totalorder %s2825_s11, %s2543_s18  ;;  %s2548_s15 = sshll.u32 %s2634_s21, 4  ;;  %s2549_s15 = int_to_ptr.vmem [resolvable:$false] %s2548_s15 }
  0x55   : > { %s2550_s19 = scalar_lea.vmem %s2549_s15, 512  ;;  %p2551_p4 = scmp.lt.s32.totalorder %s2825_s11, %s2549_s15 }
  0x56   : > { %p2546_p2 = pnand %p2544_p12, %p2530_p0  ;;  %p2552_p13 = scmp.lt.s32.totalorder %s2550_s19, %s2543_s18 }
  0x58   : > { %p2547_p5 = pneg %p2546_p2  ;;  %p2553_p6 = por %p2552_p13, %p2551_p4 }
  0x5a   : > { %p2554_p10 = pnand %p2553_p6, %p2547_p5 }
  0x5c   : > { %2557 = shalt.err (!%p2554_p10)
}
  0x5d   : > { %s2635_s12 = smov 128   ;;  %s2636_s14 = smov 8  }
  0x5e   : > { %2344 = dma.hbm_to_vmem [thread:$0]  (!%p2827_p11), %s2823_s20, 256, %s2825_s11, %s2831_s10, %s2635_s12, %s2635_s12, %s2636_s14  }
  0x5f   : > { %281 = sbr.rel (%p2730_p8) target bundleno = 2664 (0xa68), region = 48  ;;  %s2862_s23 = sand.u32 (!%p2730_p8), 1, %s2620_s25  }
  0x60   : > { %s2143_s29 = sshll.u32 (!%p2730_p8), %s2862_s23, 4  ;;  %s284_s18 = scalar_lea.sflag (!%p2730_p8), [#allocation3], %s2862_s23 }
  0x61   : > { %s287_s21 = scalar_lea.vmem (!%p2730_p8), [#allocation2], %s2143_s29  ;;  %p3190_p4 = scmp.ne.s32.totalorder (!%p2730_p8), %s3183_s30, 0 }
  0x66   : > { %2603 = dma.done.wait (%p3190_p4), %s284_s18, 256  }
  0x67   : > { %2605 = vsyncadd (%p3190_p4), %s284_s18, 4294967040  ;;  %p3191_p5 = scmp.eq.s32.totalorder %s2711_s28, 0 }
  0x69   : > { %2607 = dma.done.wait (%p3191_p5), [#allocation6], 512   ;;  %p3192_p8 = pmov %p3191_p5 }
  0x6a   : > { %v2637_v0 = vmov 0.0   ;;  %vm2638_vm0 = vmmov 0   ;;  %v2420_v1 = vld [vmem:[#allocation5] sm:$0xff]   ;;  %v2421_v2 = vld [vmem:[#allocation5 + $0x8] sm:$0xff]   ;;  %vm348_vm1 = vcmask 261120   ;;  %s2639_s30 = smov 96  }
  0x6b   : > { %2609 = vsyncadd (%p3192_p8), [#allocation6], 4294966784  ;;  %2226 = vmatprep.subr.bf16.mxu0 %v2637_v0  ;;  %2230 = vmatprep.mubr.msk.bf16.mxu0 %vm2638_vm0, %v2637_v0  ;;  %v2882_v3 = vld [vmem:[%s287_s21] sm:$0xff]  ;;  %v2884_v4 = vld [vmem:[%s287_s21 + $0x8] sm:$0xff]  ;;  %s2640_s11 = smov 32   ;;  %s2641_s15 = smov 120  }
  0x6c   : > { %2239 = vmatprep.subr.mxu1 %v2637_v0  ;;  %2241 = vmatprep.mubr.msk.f32.mxu1 %vm2638_vm0, %v2637_v0  ;;  %v331_v5 = vpack.c.bf16 %v2884_v4, %v2882_v3  ;;  %v2914_v24 = vld [vmem:[%s3176_s4] ss:$0 sm:$0xff]  ;;  %s2642_s19 = smov 112   ;;  %s2643_s12 = smov 104   ;;  %vm586_vm2 = vcmask 64512   ;;  %vm1915_vm3 = vcmask 130048  }
  0x6d   : > { %2227 = vmatpush3.bf16.msra.mxu0 %v2420_v1  ;;  %v2922_v29 = vld [vmem:[%s3175_s3] ss:$0 sm:$0xff]  ;;  %s2644_s14 = smov 64   ;;  %s2645_s18 = smov 8   ;;  %vm1918_vm4 = vcmask 195584  }
  0x6e   : > { %2228 = vmatprep.subr.bf16.mxu0 %v2637_v0  ;;  %s2646_s21 = smov 16   ;;  %s2187_s10 = sshll.u32 %s2711_s28, 8 }
  0x6f   : > { %s2029_s28 = scalar_lea.sflag [#allocation4], %s2862_s23  ;;  %p3193_p0 = scmp.ne.s32.totalorder %s3188_s16, 0 }
  0x71   : > { %2229 = vmatpush3.bf16.msra.mxu0 %v2421_v2 }
  0x72   : > { %2234 = vmatprep.subr.mxu0 %v2637_v0 }
  0x74   : > { %2231 = vmatmul.mubr.msk.bf16.vlgmr.msra.gmra.mrb[0].mxu0 %vm348_vm1, %v331_v5 }
  0x75   : > { %2236 = vmatprep.mubr.msk.f32.mxu0 %vm2638_vm0, %v2637_v0 }
 0x147   : > { %v2893_v6 = vpop.f32.mrb[0].mxu0 }
 0x148   : > { %440 = vrot.lane.b32.xlu0 %v2893_v6, %s2639_s30  ;;  %v2232_v7 = vpop.f32.mrb[1].mxu0  ;;  %v395_v22 = vsel %vm348_vm1, %v2893_v6, 0.0 }
 0x149   : > { %v2897_v8 = vpop.f32.mrb[2].mxu0 }
 0x14a   : > { %v2233_v9 = vpop.f32.mrb[3].mxu0  ;;  %v398_v23 = vsel %vm348_vm1, %v2897_v8, 0.0 }
 0x14c   : > { %442 = vrot.lane.b32.xlu0 %v2897_v8, %s2639_s30 }
 0x1ba   : > { %v441_v10 = vpop.permute.xlu0 %440 }
 0x1bb   : > { %v446_v11 = vsel %vm348_vm1, %v441_v10, 0.0 }
 0x1bc   : > { %447 = vadd.xlane.f32.xlu1 %v446_v11 }
 0x1be   : > { %v443_v12 = vpop.permute.xlu0 %442 }
 0x1bf   : > { %v449_v13 = vsel %vm348_vm1, %v443_v12, 0.0 }
 0x1c0   : > { %450 = vadd.xlane.f32.xlu1 %v449_v13 }
 0x249   : > { %v448_v14 = vpop.xlane.xlu1 %447 }
 0x24a   : > { %v452_v15 = vmul.f32 0.03125, %v448_v14 }
 0x24c   : > { %v454_v16 = vsub.f32 %v2893_v6, %v452_v15 }
 0x24d   : > { %v451_v17 = vpop.xlane.xlu1 %450 }
 0x24e   : > { %v453_v18 = vmul.f32 0.03125, %v451_v17  ;;  %v456_v19 = vmul.f32 %v454_v16, %v454_v16 }
 0x250   : > { %v455_v20 = vsub.f32 %v2897_v8, %v453_v18  ;;  %460 = vrot.lane.b32.xlu0 %v456_v19, %s2639_s30 }
 0x252   : > { %v457_v21 = vmul.f32 %v455_v20, %v455_v20 }
 0x254   : > { %462 = vrot.lane.b32.xlu1 %v457_v21, %s2639_s30 }
 0x26f   : > { %396 = vadd.xlane.f32.xlu0 %v395_v22 }
 0x278   : > { %399 = vadd.xlane.f32.xlu1 %v398_v23 }
 0x289   : > { %485 = vrot.lane.b32.xlu1 %v2914_v24, %s2640_s11 }
 0x2c2   : > { %v461_v25 = vpop.permute.xlu0 %460 }
 0x2c3   : > { %v466_v26 = vsel %vm348_vm1, %v461_v25, 0.0 }
 0x2c4   : > { %467 = vadd.xlane.f32.xlu0 %v466_v26 }
 0x2c6   : > { %v463_v27 = vpop.permute.xlu1 %462 }
 0x2c7   : > { %v469_v28 = vsel %vm348_vm1, %v463_v27, 0.0 }
 0x2c8   : > { %470 = vadd.xlane.f32.xlu0 %v469_v28 }
 0x2de   : > { %480 = vrot.lane.b32.xlu0 %v2922_v29, %s2640_s11 }
 0x2fc   : > { %v397_v30 = vpop.xlane.xlu0 %396 }
 0x2fd   : > { %v402_v31 = vmul.f32 0.03125, %v397_v30 }
 0x2ff   : > { %v404_v32 = vsub.f32 %v2893_v6, %v402_v31 }
 0x301   : > { %v406_v33 = vmul.f32 %v404_v32, %v404_v32 }
 0x303   : > { %v408_v34 = vsel %vm348_vm1, %v406_v33, 0.0 }
 0x304   : > { %409 = vadd.xlane.f32.xlu0 %v408_v34 }
 0x305   : > { %v400_v35 = vpop.xlane.xlu1 %399 }
 0x306   : > { %v403_v36 = vmul.f32 0.03125, %v400_v35 }
 0x308   : > { %v405_v37 = vsub.f32 %v2897_v8, %v403_v36 }
 0x309   : > { %v486_v49 = vpop.permute.xlu1 %485 }
 0x30a   : > { %v407_v38 = vmul.f32 %v405_v37, %v405_v37 }
 0x30c   : > { %v411_v39 = vsel %vm348_vm1, %v407_v38, 0.0 }
 0x30d   : > { %412 = vadd.xlane.f32.xlu1 %v411_v39 }
 0x351   : > { %v468_v40 = vpop.xlane.xlu0 %467 }
 0x352   : > { %v472_v41 = vmul.f32 0.03125, %v468_v40 }
 0x354   : > { %v474_v42 = vadd.f32 1e-06, %v472_v41 }
 0x355   : > { %v471_v43 = vpop.xlane.xlu0 %470 }
 0x356   : > { %2424 = vrsqrt.f32 %v474_v42  ;;  %v473_v44 = vmul.f32 0.03125, %v471_v43 }
 0x358   : > { %v475_v45 = vadd.f32 1e-06, %v473_v44 }
 0x359   : > { %v481_v47 = vpop.permute.xlu0 %480 }
 0x35a   : > { %2426 = vrsqrt.f32 %v475_v45 }
 0x360   : > { %v2425_v46 = vpop.eup %2424 }
 0x361   : > { %v478_v48 = vmul.f32 %v2425_v46, %v454_v16 }
 0x363   : > { %v483_v50 = vmul.f32 %v481_v47, %v478_v48 }
 0x364   : > { %v2427_v51 = vpop.eup %2426 }
 0x365   : > { %v479_v52 = vmul.f32 %v2427_v51, %v455_v20  ;;  %v488_v53 = vadd.f32 %v486_v49, %v483_v50 }
 0x367   : > { %v484_v54 = vmul.f32 %v481_v47, %v479_v52  ;;  %558 = vrot.lane.b32.xlu0 %v488_v53, %s2641_s15 }
 0x369   : > { %v489_v55 = vadd.f32 %v486_v49, %v484_v54 }
 0x36b   : > { %560 = vrot.lane.b32.xlu1 %v489_v55, %s2641_s15  ;;  %562 = vrot.lane.b32.xlu0 %v488_v53, %s2642_s19 }
 0x36f   : > { %566 = vrot.lane.b32.xlu1 %v488_v53, %s2643_s12  ;;  %564 = vrot.lane.b32.xlu0 %v489_v55, %s2642_s19 }
 0x373   : > { %490 = vrot.lane.b32.xlu1 %v2893_v6, %s2644_s14  ;;  %568 = vrot.lane.b32.xlu0 %v489_v55, %s2643_s12 }
 0x377   : > { %584 = vrot.lane.b32.xlu1 %v488_v53, %s2639_s30  ;;  %492 = vrot.lane.b32.xlu0 %v2897_v8, %s2644_s14 }
 0x391   : > { %v410_v56 = vpop.xlane.xlu0 %409 }
 0x392   : > { %v414_v57 = vmul.f32 0.03125, %v410_v56 }
 0x394   : > { %v416_v58 = vadd.f32 1e-06, %v414_v57 }
 0x396   : > { %2428 = vrsqrt.f32 %v416_v58 }
 0x39a   : > { %v413_v59 = vpop.xlane.xlu1 %412 }
 0x39b   : > { %v415_v60 = vmul.f32 0.03125, %v413_v59 }
 0x39d   : > { %v417_v61 = vadd.f32 1e-06, %v415_v60 }
 0x39f   : > { %2430 = vrsqrt.f32 %v417_v61 }
 0x3a0   : > { %v2429_v62 = vpop.eup %2428 }
 0x3a1   : > { %v420_v63 = vmul.f32 %v2429_v62, %v404_v32 }
 0x3a3   : > { %v428_v1 = vmul.f32 %v2922_v29, %v420_v63 }
 0x3a5   : > { %v436_v2 = vadd.f32 %v2914_v24, %v428_v1 }
 0x3a7   : > { %v540_v5 = vmul.f32 0.35355338, %v436_v2 }
 0x3a9   : > { %v2431_v7 = vpop.eup %2430  ;;  %544 = vrot.lane.b32.xlu1 %v540_v5, %s2641_s15 }
 0x3aa   : > { %v421_v9 = vmul.f32 %v2431_v7, %v405_v37 }
 0x3ac   : > { %v429_v10 = vmul.f32 %v2922_v29, %v421_v9 }
 0x3ad   : > { %548 = vrot.lane.b32.xlu1 %v540_v5, %s2642_s19 }
 0x3ae   : > { %v437_v11 = vadd.f32 %v2914_v24, %v429_v10 }
 0x3b0   : > { %v541_v12 = vmul.f32 0.35355338, %v437_v11 }
 0x3b1   : > { %552 = vrot.lane.b32.xlu1 %v540_v5, %s2643_s12 }
 0x3b2   : > { %546 = vrot.lane.b32.xlu0 %v541_v12, %s2641_s15 }
 0x3b6   : > { %550 = vrot.lane.b32.xlu0 %v541_v12, %s2642_s19 }
 0x3ba   : > { %554 = vrot.lane.b32.xlu0 %v541_v12, %s2643_s12 }
 0x3be   : > { %661 = vrot.lane.b32.xlu0 %v489_v55, %s2639_s30 }
 0x3d9   : > { %v559_v13 = vpop.permute.xlu0 %558 }
 0x3da   : > { %737 = vrot.lane.b32.xlu1 %v559_v13, %s2639_s30 }
 0x3dd   : > { %v563_v14 = vpop.permute.xlu0 %562  ;;  %v561_v15 = vpop.permute.xlu1 %560 }
 0x3de   : > { %889 = vrot.lane.b32.xlu1 %v563_v14, %s2639_s30  ;;  %813 = vrot.lane.b32.xlu0 %v561_v15, %s2639_s30 }
 0x3e1   : > { %v565_v16 = vpop.permute.xlu0 %564  ;;  %v567_v17 = vpop.permute.xlu1 %566 }
 0x3e2   : > { %965 = vrot.lane.b32.xlu0 %v565_v16, %s2639_s30  ;;  %1041 = vrot.lane.b32.xlu1 %v567_v17, %s2639_s30 }
 0x3e5   : > { %v569_v18 = vpop.permute.xlu0 %568  ;;  %v491_v19 = vpop.permute.xlu1 %490 }
 0x3e6   : > { %1117 = vrot.lane.b32.xlu0 %v569_v18, %s2639_s30  ;;  %v496_v23 = vsel %vm348_vm1, %v491_v19, 0.0  ;;  %s2647_s30 = smov 24  }
 0x3e9   : > { %v585_v20 = vpop.permute.xlu1 %584  ;;  %v493_v21 = vpop.permute.xlu0 %492 }
 0x3ea   : > { %2235 = vmatpush3.xpose.msk.msra.mxu0 %vm586_vm2, %v585_v20  ;;  %v499_v22 = vsel %vm348_vm1, %v493_v21, 0.0 }
 0x3eb   : > { %2249 = vmatprep.subr.mxu0 %v2637_v0 }
 0x3ed   : > { %2237 = vmatmul.mubr.msk.f32.vlgmr.msra.gmra.mrb[4].mxu0 %vm586_vm2, %v540_v5 }
 0x3ee   : > { %2251 = vmatprep.mubr.msk.f32.mxu0 %vm2638_vm0, %v2637_v0 }
 0x405   : > { %500 = vadd.xlane.f32.xlu0 %v499_v22 }
 0x406   : > { %497 = vadd.xlane.f32.xlu1 %v496_v23 }
 0x41b   : > { %v545_v30 = vpop.permute.xlu1 %544 }
 0x41f   : > { %v549_v31 = vpop.permute.xlu1 %548 }
 0x423   : > { %v553_v32 = vpop.permute.xlu1 %552 }
 0x424   : > { %v547_v25 = vpop.permute.xlu0 %546 }
 0x428   : > { %v551_v26 = vpop.permute.xlu0 %550 }
 0x42c   : > { %v555_v27 = vpop.permute.xlu0 %554 }
 0x430   : > { %v662_v28 = vpop.permute.xlu0 %661 }
 0x431   : > { %2240 = vmatpush3.xpose.msk.msra.mxu1 %vm586_vm2, %v662_v28 }
 0x432   : > { %2244 = vmatprep.subr.mxu1 %v2637_v0 }
 0x434   : > { %2242 = vmatmul.mubr.msk.f32.vlgmr.msra.gmra.mrb[0].mxu1 %vm586_vm2, %v541_v12 }
 0x435   : > { %2246 = vmatprep.mubr.msk.f32.mxu1 %vm2638_vm0, %v2637_v0 }
 0x44c   : > { %v738_v33 = vpop.permute.xlu1 %737 }
 0x44d   : > { %2245 = vmatpush3.xpose.msk.msra.mxu1 %vm586_vm2, %v738_v33 }
 0x44e   : > { %2254 = vmatprep.subr.mxu1 %v2637_v0 }
 0x450   : > { %v814_v34 = vpop.permute.xlu0 %813  ;;  %2247 = vmatmul.mubr.msk.f32.vlgmr.msra.gmra.mrb[2].mxu1 %vm586_vm2, %v545_v30  ;;  %v890_v35 = vpop.permute.xlu1 %889 }
 0x451   : > { %2250 = vmatpush3.xpose.msk.msra.mxu0 %vm586_vm2, %v814_v34  ;;  %2255 = vmatpush3.xpose.msk.msra.mxu1 %vm586_vm2, %v890_v35 }
 0x452   : > { %2256 = vmatprep.mubr.msk.f32.mxu1 %vm2638_vm0, %v2637_v0  ;;  %2259 = vmatprep.subr.mxu0 %v2637_v0 }
 0x453   : > { %2264 = vmatprep.subr.mxu1 %v2637_v0 }
 0x454   : > { %v966_v36 = vpop.permute.xlu0 %965  ;;  %2252 = vmatmul.mubr.msk.f32.vlgmr.msra.gmra.mrb[6].mxu0 %vm586_vm2, %v547_v25  ;;  %2257 = vmatmul.mubr.msk.f32.vlgmr.msra.gmra.mrb[4].mxu1 %vm586_vm2, %v549_v31  ;;  %v1042_v37 = vpop.permute.xlu1 %1041 }
 0x455   : > { %2260 = vmatpush3.xpose.msk.msra.mxu0 %vm586_vm2, %v966_v36  ;;  %2265 = vmatpush3.xpose.msk.msra.mxu1 %vm586_vm2, %v1042_v37 }
 0x456   : > { %2261 = vmatprep.mubr.msk.f32.mxu0 %vm2638_vm0, %v2637_v0  ;;  %2266 = vmatprep.mubr.msk.f32.mxu1 %vm2638_vm0, %v2637_v0 }
 0x457   : > { %2269 = vmatprep.subr.mxu0 %v2637_v0  ;;  %2274 = vmatprep.subr.mxu1 %v2637_v0 }
 0x458   : > { %v1118_v38 = vpop.permute.xlu0 %1117  ;;  %2262 = vmatmul.mubr.msk.f32.vlgmr.msra.gmra.mrb[8].mxu0 %vm586_vm2, %v551_v26  ;;  %2267 = vmatmul.mubr.msk.f32.vlgmr.msra.gmra.mrb[6].mxu1 %vm586_vm2, %v553_v32 }
 0x459   : > { %2270 = vmatpush3.xpose.msk.msra.mxu0 %vm586_vm2, %v1118_v38  ;;  %2271 = vmatprep.mubr.msk.f32.mxu0 %vm2638_vm0, %v2637_v0 }
 0x45a   : > { %2279 = vmatprep.subr.mxu0 %v2637_v0  ;;  %2276 = vmatprep.mubr.msk.f32.mxu1 %vm2638_vm0, %v2637_v0 }
 0x45c   : > { %2272 = vmatmul.mubr.msk.f32.vlgmr.msra.gmra.mrb[10].mxu0 %vm586_vm2, %v555_v27 }
 0x45d   : > { %2281 = vmatprep.mubr.msk.f32.mxu0 %vm2638_vm0, %v2637_v0 }
 0x492   : > { %v501_v39 = vpop.xlane.xlu0 %500 }
 0x493   : > { %v503_v40 = vmul.f32 0.03125, %v501_v39  ;;  %v498_v41 = vpop.xlane.xlu1 %497 }
 0x494   : > { %v502_v42 = vmul.f32 0.03125, %v498_v41 }
 0x495   : > { %v505_v43 = vsub.f32 %v2897_v8, %v503_v40 }
 0x496   : > { %v504_v44 = vsub.f32 %v2893_v6, %v502_v42 }
 0x497   : > { %v507_v45 = vmul.f32 %v505_v43, %v505_v43 }
 0x498   : > { %v506_v46 = vmul.f32 %v504_v44, %v504_v44 }
 0x499   : > { %512 = vrot.lane.b32.xlu1 %v507_v45, %s2644_s14 }
 0x49a   : > { %510 = vrot.lane.b32.xlu0 %v506_v46, %s2644_s14 }
 0x4c0   : > { %v3003_v47 = vpop.f32.mrb[4].mxu0 }
 0x4c1   : > { %v2238_v48 = vpop.f32.mrb[5].mxu0  ;;  %v1193_v32 = vsel %vm586_vm2, %v3003_v47, -inf }
 0x507   : > { %v3005_v49 = vpop.f32.mrb[0].mxu1 }
 0x508   : > { %v2243_v50 = vpop.f32.mrb[1].mxu1  ;;  %v1196_v30 = vsel %vm586_vm2, %v3005_v49, -inf }
 0x50b   : > { %v513_v51 = vpop.permute.xlu1 %512 }
 0x50c   : > { %v511_v52 = vpop.permute.xlu0 %510  ;;  %v519_v53 = vsel %vm348_vm1, %v513_v51, 0.0 }
 0x50d   : > { %520 = vadd.xlane.f32.xlu0 %v519_v53  ;;  %v516_v8 = vsel %vm348_vm1, %v511_v52, 0.0 }
 0x50e   : > { %517 = vadd.xlane.f32.xlu1 %v516_v8 }
 0x51f   : > { %535 = vrot.lane.b32.xlu1 %v2914_v24, %s2644_s14 }
 0x523   : > { %v3011_v6 = vpop.f32.mrb[2].mxu1  ;;  %530 = vrot.lane.b32.xlu0 %v2922_v29, %s2644_s14 }
 0x524   : > { %v2248_v54 = vpop.f32.mrb[3].mxu1  ;;  %v1199_v31 = vsel %vm586_vm2, %v3011_v6, -inf }
 0x527   : > { %v3015_v55 = vpop.f32.mrb[6].mxu0  ;;  %v3017_v56 = vpop.f32.mrb[4].mxu1 }
 0x528   : > { %v2253_v57 = vpop.f32.mrb[7].mxu0  ;;  %v2258_v58 = vpop.f32.mrb[5].mxu1  ;;  %v1205_v33 = vsel %vm586_vm2, %v3017_v56, -inf  ;;  %v1202_v34 = vsel %vm586_vm2, %v3015_v55, -inf }
 0x52b   : > { %v3019_v59 = vpop.f32.mrb[8].mxu0  ;;  %v3021_v60 = vpop.f32.mrb[6].mxu1 }
 0x52c   : > { %v2263_v61 = vpop.f32.mrb[9].mxu0  ;;  %v2268_v62 = vpop.f32.mrb[7].mxu1  ;;  %v1211_v35 = vsel %vm586_vm2, %v3021_v60, -inf  ;;  %v1208_v36 = vsel %vm586_vm2, %v3019_v59, -inf }
 0x52f   : > { %v3023_v63 = vpop.f32.mrb[10].mxu0 }
 0x530   : > { %v2273_v24 = vpop.f32.mrb[11].mxu0  ;;  %v1214_v37 = vsel %vm586_vm2, %v3023_v63, -inf }
 0x59a   : > { %v521_v1 = vpop.xlane.xlu0 %520 }
 0x59b   : > { %v523_v2 = vmul.f32 0.03125, %v521_v1  ;;  %v518_v5 = vpop.xlane.xlu1 %517 }
 0x59c   : > { %v522_v29 = vmul.f32 0.03125, %v518_v5 }
 0x59d   : > { %v525_v7 = vadd.f32 1e-06, %v523_v2 }
 0x59e   : > { %v524_v9 = vadd.f32 1e-06, %v522_v29  ;;  %v531_v11 = vpop.permute.xlu0 %530 }
 0x59f   : > { %2432 = vrsqrt.f32 %v525_v7  ;;  %v536_v15 = vpop.permute.xlu1 %535 }
 0x5a0   : > { %2434 = vrsqrt.f32 %v524_v9 }
 0x5a9   : > { %v2433_v10 = vpop.eup %2432 }
 0x5aa   : > { %v2435_v12 = vpop.eup %2434  ;;  %v529_v13 = vmul.f32 %v2433_v10, %v505_v43 }
 0x5ab   : > { %v528_v14 = vmul.f32 %v2435_v12, %v504_v44 }
 0x5ac   : > { %v534_v16 = vmul.f32 %v531_v11, %v529_v13 }
 0x5ad   : > { %v533_v17 = vmul.f32 %v531_v11, %v528_v14 }
 0x5ae   : > { %v539_v18 = vadd.f32 %v536_v15, %v534_v16 }
 0x5af   : > { %v538_v19 = vadd.f32 %v536_v15, %v533_v17 }
 0x5b0   : > { %574 = vrot.lane.b32.xlu0 %v539_v18, %s2641_s15 }
 0x5b1   : > { %572 = vrot.lane.b32.xlu1 %v538_v19, %s2641_s15  ;;  %s325_s15 = scalar_lea.vmem [#allocation8], %s2143_s29  ;;  %s2648_s29 = smov [#allocation8]  }
 0x5b2   : > { %s2562_s9 = sshll.u32 %s2648_s29, 4  ;;  %s2563_s9 = int_to_ptr.vmem [resolvable:$false] %s2562_s9 }
 0x5b3   : > { %s2564_s20 = scalar_lea.vmem %s2563_s9, 512 }
 0x5b4   : > { %578 = vrot.lane.b32.xlu0 %v539_v18, %s2642_s19 }
 0x5b5   : > { %576 = vrot.lane.b32.xlu1 %v538_v19, %s2642_s19  ;;  %s2042_s19 = sshll.u32 %s325_s15, 4  ;;  %s3126_s19 = int_to_ptr.vmem [resolvable:$true] %s2042_s19 }
 0x5b6   : > { %p2565_p7 = scmp.lt.s32.totalorder %s3126_s19, %s2563_s9 }
 0x5b8   : > { %582 = vrot.lane.b32.xlu0 %v539_v18, %s2643_s12 }
 0x5b9   : > { %580 = vrot.lane.b32.xlu1 %v538_v19, %s2643_s12 }
 0x5bc   : > { %1241 = vrot.lane.b32.xlu0 %v538_v19, %s2644_s14 }
 0x5bd   : > { %1317 = vrot.lane.b32.xlu1 %v539_v18, %s2644_s14 }
 0x622   : > { %v575_v20 = vpop.permute.xlu0 %574 }
 0x623   : > { %1469 = vrot.lane.b32.xlu0 %v575_v20, %s2644_s14  ;;  %v573_v21 = vpop.permute.xlu1 %572 }
 0x624   : > { %1393 = vrot.lane.b32.xlu1 %v573_v21, %s2644_s14 }
 0x626   : > { %v579_v22 = vpop.permute.xlu0 %578 }
 0x627   : > { %1621 = vrot.lane.b32.xlu0 %v579_v22, %s2644_s14  ;;  %v577_v23 = vpop.permute.xlu1 %576 }
 0x628   : > { %1545 = vrot.lane.b32.xlu1 %v577_v23, %s2644_s14 }
 0x62a   : > { %v583_v25 = vpop.permute.xlu0 %582 }
 0x62b   : > { %v581_v26 = vpop.permute.xlu1 %580 }
 0x62e   : > { %v1242_v27 = vpop.permute.xlu0 %1241 }
 0x62f   : > { %2275 = vmatpush3.msra.mxu1 %v1242_v27  ;;  %v1318_v28 = vpop.permute.xlu1 %1317 }
 0x630   : > { %2280 = vmatpush3.msra.mxu0 %v1318_v28  ;;  %2284 = vmatprep.subr.mxu1 %v2637_v0 }
 0x631   : > { %2289 = vmatprep.subr.mxu0 %v2637_v0 }
 0x646   : > { %1197 = vmax.xlane.f32.xlu0 %v1196_v30 }
 0x64a   : > { %1200 = vmax.xlane.f32.xlu0 %v1199_v31 }
 0x64c   : > { %1194 = vmax.xlane.f32.xlu1 %v1193_v32 }
 0x64e   : > { %1206 = vmax.xlane.f32.xlu0 %v1205_v33  ;;  %v2422_v33 = vld [vmem:[#allocation7] sm:$0xff]  }
 0x650   : > { %1203 = vmax.xlane.f32.xlu1 %v1202_v34 }
 0x652   : > { %1212 = vmax.xlane.f32.xlu0 %v1211_v35 }
 0x654   : > { %1209 = vmax.xlane.f32.xlu1 %v1208_v36 }
 0x658   : > { %1215 = vmax.xlane.f32.xlu1 %v1214_v37 }
 0x668   : > { %1773 = vrot.lane.b32.xlu0 %v583_v25, %s2644_s14 }
 0x669   : > { %1697 = vrot.lane.b32.xlu1 %v581_v26, %s2644_s14 }
 0x695   : > { %v1470_v38 = vpop.permute.xlu0 %1469 }
 0x696   : > { %v1394_v39 = vpop.permute.xlu1 %1393 }
 0x699   : > { %v1622_v40 = vpop.permute.xlu0 %1621 }
 0x69a   : > { %v1546_v43 = vpop.permute.xlu1 %1545 }
 0x6d3   : > { %v1198_v41 = vpop.xlane.xlu0 %1197 }
 0x6d4   : > { %v1218_v42 = vsub.f32 %v3005_v49, %v1198_v41 }
 0x6d6   : > { %v1227_v44 = vmul.f32 1.442695, %v1218_v42  ;;  %v2423_v42 = vld [vmem:[#allocation7 + $0x8] sm:$0xff]  }
 0x6d7   : > { %v1201_v45 = vpop.xlane.xlu0 %1200 }
 0x6d8   : > { %2436 = vpow2.f32 %v1227_v44  ;;  %v1219_v46 = vsub.f32 %v3011_v6, %v1201_v45 }
 0x6d9   : > { %v1195_v48 = vpop.xlane.xlu1 %1194 }
 0x6da   : > { %v1229_v50 = vmul.f32 1.442695, %v1219_v46  ;;  %v1217_v51 = vsub.f32 %v3003_v47, %v1195_v48 }
 0x6db   : > { %v1207_v52 = vpop.xlane.xlu0 %1206 }
 0x6dc   : > { %2438 = vpow2.f32 %v1229_v50  ;;  %v1225_v53 = vmul.f32 1.442695, %v1217_v51  ;;  %v1221_v8 = vsub.f32 %v3017_v56, %v1207_v52 }
 0x6dd   : > { %v1204_v54 = vpop.xlane.xlu1 %1203 }
 0x6de   : > { %2440 = vpow2.f32 %v1225_v53  ;;  %v1220_v57 = vsub.f32 %v3015_v55, %v1204_v54  ;;  %v1233_v61 = vmul.f32 1.442695, %v1221_v8 }
 0x6df   : > { %v1213_v49 = vpop.xlane.xlu0 %1212 }
 0x6e0   : > { %v1231_v58 = vmul.f32 1.442695, %v1220_v57  ;;  %v1223_v62 = vsub.f32 %v3021_v60, %v1213_v49 }
 0x6e1   : > { %v1210_v24 = vpop.xlane.xlu1 %1209 }
 0x6e2   : > { %v2437_v6 = vpop.eup %2436  ;;  %2442 = vpow2.f32 %v1231_v58  ;;  %v1222_v1 = vsub.f32 %v3019_v59, %v1210_v24  ;;  %v1237_v56 = vmul.f32 1.442695, %v1223_v62 }
 0x6e3   : > { %2282 = vmatmul.mubr.msk.f32.vlgmr.msra.gmra.mrb[12].mxu0 %vm586_vm2, %v2437_v6  ;;  %2444 = vpow2.f32 %v1233_v61  ;;  %v1774_v13 = vpop.permute.xlu0 %1773  ;;  %v1852_v20 = vsel %vm586_vm2, %v2437_v6, 0.0 }
 0x6e4   : > { %v1235_v47 = vmul.f32 1.442695, %v1222_v1  ;;  %2290 = vmatpush3.msra.mxu0 %v1470_v38  ;;  %2291 = vmatprep.mubr.msk.f32.mxu0 %vm2638_vm0, %v2637_v0 }
 0x6e5   : > { %v1216_v55 = vpop.xlane.xlu1 %1215  ;;  %2299 = vmatprep.subr.mxu0 %v2637_v0 }
 0x6e6   : > { %v2439_v2 = vpop.eup %2438  ;;  %2446 = vpow2.f32 %v1235_v47  ;;  %v1224_v60 = vsub.f32 %v3023_v63, %v1216_v55 }
 0x6e7   : > { %v1855_v5 = vsel %vm586_vm2, %v2439_v2, 0.0  ;;  %2448 = vpow2.f32 %v1237_v56 }
 0x6e8   : > { %v2441_v29 = vpop.eup %2440  ;;  %v1239_v59 = vmul.f32 1.442695, %v1224_v60  ;;  %1856 = vadd.xlane.f32.xlu1 %v1855_v5 }
 0x6e9   : > { %2277 = vmatmul.mubr.msk.f32.vlgmr.msra.gmra.mrb[8].mxu1 %vm586_vm2, %v2441_v29  ;;  %v1698_v11 = vpop.permute.xlu1 %1697  ;;  %v1849_v19 = vsel %vm586_vm2, %v2441_v29, 0.0 }
 0x6ea   : > { %2450 = vpow2.f32 %v1239_v59  ;;  %2285 = vmatpush3.msra.mxu1 %v1394_v39  ;;  %2286 = vmatprep.mubr.msk.f32.mxu1 %vm2638_vm0, %v2637_v0 }
 0x6eb   : > { %2294 = vmatprep.subr.mxu1 %v2637_v0 }
 0x6ec   : > { %v2443_v7 = vpop.eup %2442 }
 0x6ed   : > { %2287 = vmatmul.mubr.msk.f32.vlgmr.msra.gmra.mrb[10].mxu1 %vm586_vm2, %v2439_v2  ;;  %2292 = vmatmul.mubr.msk.f32.vlgmr.msra.gmra.mrb[14].mxu0 %vm586_vm2, %v2443_v7  ;;  %v1858_v63 = vsel %vm586_vm2, %v2443_v7, 0.0  ;;  %v2445_v9 = vpop.eup %2444 }
 0x6ee   : > { %2295 = vmatpush3.msra.mxu1 %v1546_v43  ;;  %2300 = vmatpush3.msra.mxu0 %v1622_v40  ;;  %v1861_v14 = vsel %vm586_vm2, %v2445_v9, 0.0 }
 0x6ef   : > { %1859 = vadd.xlane.f32.xlu0 %v1858_v63  ;;  %2296 = vmatprep.mubr.msk.f32.mxu1 %vm2638_vm0, %v2637_v0 }
 0x6f0   : > { %v2447_v10 = vpop.eup %2446  ;;  %2301 = vmatprep.mubr.msk.f32.mxu0 %vm2638_vm0, %v2637_v0  ;;  %2304 = vmatprep.subr.mxu1 %v2637_v0 }
 0x6f1   : > { %2309 = vmatprep.subr.mxu0 %v2637_v0  ;;  %2297 = vmatmul.mubr.msk.f32.vlgmr.msra.gmra.mrb[12].mxu1 %vm586_vm2, %v2445_v9  ;;  %v1864_v12 = vsel %vm586_vm2, %v2447_v10, 0.0  ;;  %v2449_v15 = vpop.eup %2448 }
 0x6f2   : > { %2302 = vmatmul.mubr.msk.f32.vlgmr.msra.gmra.mrb[16].mxu0 %vm586_vm2, %v2447_v10  ;;  %2305 = vmatpush3.msra.mxu1 %v1698_v11  ;;  %v1867_v18 = vsel %vm586_vm2, %v2449_v15, 0.0 }
 0x6f3   : > { %2310 = vmatpush3.msra.mxu0 %v1774_v13  ;;  %1862 = vadd.xlane.f32.xlu0 %v1861_v14 }
 0x6f4   : > { %v2451_v16 = vpop.eup %2450  ;;  %1865 = vadd.xlane.f32.xlu1 %v1864_v12  ;;  %2306 = vmatprep.mubr.msk.f32.mxu1 %vm2638_vm0, %v2637_v0 }
 0x6f5   : > { %2311 = vmatprep.mubr.msk.f32.mxu0 %vm2638_vm0, %v2637_v0  ;;  %2307 = vmatmul.mubr.msk.f32.vlgmr.msra.gmra.mrb[14].mxu1 %vm586_vm2, %v2449_v15  ;;  %v1870_v17 = vsel %vm586_vm2, %v2451_v16, 0.0 }
 0x6f6   : > { %2312 = vmatmul.mubr.msk.f32.vlgmr.msra.gmra.mrb[18].mxu0 %vm586_vm2, %v2451_v16  ;;  %2314 = vmatprep.subr.bf16.mxu1 %v2637_v0 }
 0x6f7   : > { %1868 = vadd.xlane.f32.xlu0 %v1867_v18  ;;  %2318 = vmatprep.mubr.msk.bf16.mxu1 %vm2638_vm0, %v2637_v0 }
 0x6f8   : > { %1871 = vadd.xlane.f32.xlu1 %v1870_v17  ;;  %2315 = vmatpush3.bf16.msra.mxu1 %v2422_v33 }
 0x6f9   : > { %2316 = vmatprep.subr.bf16.mxu1 %v2637_v0 }
 0x6fb   : > { %1850 = vadd.xlane.f32.xlu0 %v1849_v19 }
 0x6fc   : > { %1853 = vadd.xlane.f32.xlu1 %v1852_v20  ;;  %2317 = vmatpush3.bf16.msra.mxu1 %v2423_v42 }
 0x775   : > { %v1857_v22 = vpop.xlane.xlu1 %1856 }
 0x776   : > { %2452 = vrcp.f32 %v1857_v22 }
 0x77c   : > { %v1860_v21 = vpop.xlane.xlu0 %1859 }
 0x77d   : > { %2454 = vrcp.f32 %v1860_v21 }
 0x780   : > { %v1863_v23 = vpop.xlane.xlu0 %1862  ;;  %v2453_v34 = vpop.eup %2452 }
 0x781   : > { %v1866_v25 = vpop.xlane.xlu1 %1865  ;;  %2456 = vrcp.f32 %v1863_v23 }
 0x782   : > { %2458 = vrcp.f32 %v1866_v25 }
 0x784   : > { %v1869_v28 = vpop.xlane.xlu0 %1868 }
 0x785   : > { %v1872_v30 = vpop.xlane.xlu1 %1871  ;;  %2460 = vrcp.f32 %v1869_v28 }
 0x786   : > { %2462 = vrcp.f32 %v1872_v30 }
 0x787   : > { %v2455_v35 = vpop.eup %2454 }
 0x788   : > { %v1851_v1 = vpop.xlane.xlu0 %1850 }
 0x789   : > { %v1854_v47 = vpop.xlane.xlu1 %1853  ;;  %2464 = vrcp.f32 %v1851_v1 }
 0x78a   : > { %2466 = vrcp.f32 %v1854_v47 }
 0x78b   : > { %v2457_v44 = vpop.eup %2456 }
 0x78c   : > { %v2459_v46 = vpop.eup %2458 }
 0x78f   : > { %v2461_v8 = vpop.eup %2460 }
 0x790   : > { %v2463_v49 = vpop.eup %2462 }
 0x793   : > { %v2465_v2 = vpop.eup %2464 }
 0x794   : > { %v2467_v29 = vpop.eup %2466 }
 0x7b6   : > { %v1389_v26 = vpop.f32.mrb[12].mxu0 }
 0x7b7   : > { %v2283_v27 = vpop.f32.mrb[13].mxu0  ;;  %v1882_v63 = vmul.f32 %v2467_v29, %v1389_v26 }
 0x7bc   : > { %v1313_v31 = vpop.f32.mrb[8].mxu1 }
 0x7bd   : > { %v2278_v32 = vpop.f32.mrb[9].mxu1  ;;  %v1881_v9 = vmul.f32 %v2465_v2, %v1313_v31 }
 0x7c0   : > { %v1465_v36 = vpop.f32.mrb[10].mxu1  ;;  %v1541_v37 = vpop.f32.mrb[14].mxu0 }
 0x7c1   : > { %v1883_v38 = vmul.f32 %v2453_v34, %v1465_v36  ;;  %v1884_v39 = vmul.f32 %v2455_v35, %v1541_v37  ;;  %v2288_v40 = vpop.f32.mrb[11].mxu1  ;;  %v2293_v41 = vpop.f32.mrb[15].mxu0 }
 0x7c3   : > { %v2405_v43 = vpack.i.bf16 %v1884_v39, %v1883_v38 }
 0x7c4   : > { %v1617_v45 = vpop.f32.mrb[12].mxu1 }
 0x7c5   : > { %v1885_v48 = vmul.f32 %v2457_v44, %v1617_v45  ;;  %v1693_v50 = vpop.f32.mrb[16].mxu0  ;;  %v2298_v51 = vpop.f32.mrb[13].mxu1  ;;  %2406 = vrot.lane.b32.xlu0 %v2405_v43, %s2645_s18  ;;  %v2179_v45 = vld [vmem:[%s3177_s5] ss:$0 sm:$0xff] }
 0x7c6   : > { %v1886_v52 = vmul.f32 %v2459_v46, %v1693_v50  ;;  %v2303_v53 = vpop.f32.mrb[17].mxu0 }
 0x7c8   : > { %v2410_v54 = vpack.i.bf16 %v1886_v52, %v1885_v48  ;;  %v1769_v57 = vpop.f32.mrb[14].mxu1  ;;  %v2180_v48 = vld [vmem:[%s3178_s6] ss:$0 sm:$0xff] }
 0x7c9   : > { %v1887_v58 = vmul.f32 %v2461_v8, %v1769_v57  ;;  %v1845_v0 = vpop.f32.mrb[18].mxu0  ;;  %v2308_v61 = vpop.f32.mrb[15].mxu1 }
 0x7ca   : > { %v1888_v62 = vmul.f32 %v2463_v49, %v1845_v0  ;;  %2411 = vrot.lane.b32.xlu1 %v2410_v54, %s2646_s21  ;;  %v2313_v24 = vpop.f32.mrb[19].mxu0  ;;  %s3124_s21 = scalar_lea.hbm %s3179_s7, %s2187_s10 }
 0x7cc   : > { %v2415_v6 = vpack.i.bf16 %v1888_v62, %v1887_v58 }
 0x7ce   : > { %2416 = vrot.lane.b32.xlu1 %v2415_v6, %s2647_s30  ;;  %s2558_s30 = scalar_lea.vmem %s3126_s19, 256 }
 0x7cf   : > { %p2559_p11 = scmp.ne.s32.totalorder %s3126_s19, %s2558_s30  ;;  %p2566_p9 = scmp.lt.s32.totalorder %s2564_s20, %s2558_s30 }
 0x7d1   : > { %p2560_p1 = pnand %p2559_p11, %p3193_p0  ;;  %p2567_p12 = por %p2566_p9, %p2565_p7 }
 0x7d3   : > { %p2561_p3 = pneg %p2560_p1 }
 0x7d5   : > { %p2568_p2 = pnand %p2567_p12, %p2561_p3 }
 0x837   : > { %v2407_v56 = vpop.permute.xlu0 %2406 }
 0x838   : > { %v2409_v60 = vunpack.i.h.bf16 %v2407_v56  ;;  %v2408_v5 = vunpack.i.l.bf16 %v2407_v56 }
 0x83a   : > { %v1914_v11 = vsel %vm586_vm2, %v1882_v63, %v2409_v60  ;;  %v1913_v12 = vsel %vm586_vm2, %v1881_v9, %v2408_v5 }
 0x83c   : > { %v2412_v55 = vpop.permute.xlu1 %2411 }
 0x83d   : > { %v2414_v59 = vunpack.i.h.bf16 %v2412_v55  ;;  %v2413_v7 = vunpack.i.l.bf16 %v2412_v55 }
 0x83f   : > { %v1917_v15 = vsel %vm1915_vm3, %v1914_v11, %v2414_v59  ;;  %v1916_v16 = vsel %vm1915_vm3, %v1913_v12, %v2413_v7 }
 0x840   : > { %v2417_v10 = vpop.permute.xlu1 %2416 }
 0x841   : > { %v2419_v13 = vunpack.i.h.bf16 %v2417_v10  ;;  %v2418_v14 = vunpack.i.l.bf16 %v2417_v10 }
 0x843   : > { %v1920_v17 = vsel %vm1918_vm4, %v1917_v15, %v2419_v13  ;;  %v1919_v18 = vsel %vm1918_vm4, %v1916_v16, %v2418_v14 }
 0x844   : > { %v1921_v19 = vpack.c.bf16 %v1920_v17, %v1919_v18 }
 0x846   : > { %2319 = vmatmul.mubr.msk.bf16.vlgmr.msra.gmra.mrb[16].mxu1 %vm348_vm1, %v1921_v19 }
 0x919   : > { %v1975_v20 = vpop.f32.mrb[16].mxu1 }
 0x91a   : > { %v1976_v21 = vadd.f32 %v1975_v20, %v2882_v3  ;;  %v2320_v22 = vpop.f32.mrb[17].mxu1 }
 0x91b   : > { %v1978_v23 = vpop.f32.mrb[18].mxu1 }
 0x91c   : > { %v1979_v25 = vadd.f32 %v1978_v23, %v2884_v4  ;;  %v2321_v26 = vpop.f32.mrb[19].mxu1  ;;  %v1984_v27 = vsel %vm348_vm1, %v1976_v21, 0.0 }
 0x91d   : > { %1985 = vadd.xlane.f32.xlu0 %v1984_v27 }
 0x91e   : > { %v1987_v28 = vsel %vm348_vm1, %v1979_v25, 0.0 }
 0x91f   : > { %1988 = vadd.xlane.f32.xlu1 %v1987_v28 }
 0x9aa   : > { %v1986_v30 = vpop.xlane.xlu0 %1985 }
 0x9ab   : > { %v1990_v31 = vmul.f32 0.03125, %v1986_v30 }
 0x9ac   : > { %v1989_v32 = vpop.xlane.xlu1 %1988 }
 0x9ad   : > { %v1992_v33 = vsub.f32 %v1976_v21, %v1990_v31  ;;  %v1991_v34 = vmul.f32 0.03125, %v1989_v32 }
 0x9af   : > { %v1993_v35 = vsub.f32 %v1979_v25, %v1991_v34  ;;  %v1994_v36 = vmul.f32 %v1992_v33, %v1992_v33 }
 0x9b1   : > { %v1996_v3 = vsel %vm348_vm1, %v1994_v36, 0.0  ;;  %v1995_v37 = vmul.f32 %v1993_v35, %v1993_v35 }
 0x9b2   : > { %1997 = vadd.xlane.f32.xlu0 %v1996_v3 }
 0x9b3   : > { %v1999_v4 = vsel %vm348_vm1, %v1995_v37, 0.0 }
 0x9b6   : > { %2000 = vadd.xlane.f32.xlu0 %v1999_v4 }
 0xa3f   : > { %v1998_v38 = vpop.xlane.xlu0 %1997 }
 0xa40   : > { %v2002_v39 = vmul.f32 0.03125, %v1998_v38 }
 0xa42   : > { %v2004_v40 = vadd.f32 1e-06, %v2002_v39 }
 0xa43   : > { %v2001_v41 = vpop.xlane.xlu0 %2000 }
 0xa44   : > { %2468 = vrsqrt.f32 %v2004_v40  ;;  %v2003_v42 = vmul.f32 0.03125, %v2001_v41 }
 0xa46   : > { %v2005_v43 = vadd.f32 1e-06, %v2003_v42 }
 0xa48   : > { %2470 = vrsqrt.f32 %v2005_v43 }
 0xa4e   : > { %v2469_v44 = vpop.eup %2468 }
 0xa4f   : > { %v2008_v46 = vmul.f32 %v2469_v44, %v1992_v33 }
 0xa51   : > { %v2016_v50 = vmul.f32 %v2179_v45, %v2008_v46 }
 0xa52   : > { %v2471_v51 = vpop.eup %2470 }
 0xa53   : > { %v2024_v52 = vadd.f32 %v2180_v48, %v2016_v50  ;;  %v2009_v53 = vmul.f32 %v2471_v51, %v1993_v35 }
 0xa55   : > { %v2017_v8 = vmul.f32 %v2179_v45, %v2009_v53  ;;  %2026 = vst.msk [vmem:[%s325_s15] sm:$0xff] %vm348_vm1, %v2024_v52 }
 0xa57   : > { %v2025_v54 = vadd.f32 %v2180_v48, %v2017_v8 }
 0xa59   : > { %2027 = vst.msk [vmem:[%s325_s15 + $0x8] sm:$0xff] %vm348_vm1, %v2025_v54 }
 0xa5a   : > { %2571 = shalt.err (!%p2568_p2)
}
 0xa5b   : > { %s2572_s11 = scalar_lea.hbm %s3124_s21, 256  ;;  %s2576_s15 = scalar_lea.hbm %s3179_s7, 512 }
 0xa5c   : > { %p2573_p13 = scmp.ne.s32.totalorder %s3124_s21, %s2572_s11  ;;  %p2577_p4 = scmp.lt.u32.totalorder %s3124_s21, %s3179_s7 }
 0xa5d   : > { %p2578_p5 = scmp.lt.u32.totalorder %s2576_s15, %s2572_s11  ;;  %p2580_p11 = scmp.lt.u32.totalorder %s2572_s11, %s3124_s21 }
 0xa5e   : > { %p2574_p6 = pnand %p2573_p13, %p3193_p0 }
 0xa5f   : > { %p2579_p8 = por %p2578_p5, %p2577_p4 }
 0xa60   : > { %p2575_p10 = pneg %p2574_p6 }
 0xa61   : > { %p2581_p1 = por %p2580_p11, %p2579_p8 }
 0xa63   : > { %p2582_p3 = pnand %p2581_p1, %p2575_p10 }
 0xa65   : > { %2585 = shalt.err (!%p2582_p3)
}
 0xa66   : > { %s2649_s30 = smov 128  }
 0xa67   : > { %2332 = dma.vmem_to_hbm [thread:$0]  (%p3193_p0), %s3126_s19, 256, %s3124_s21, %s2029_s28, %s2649_s30, %s2649_s30, %s2645_s18  }
 0xa68 PF: > { %s2057_s29 = sand.u32 1, %s2616_s24   ;;  %p3194_p7 = scmp.ne.s32.totalorder %s3184_s8, 0 }
 0xa69   : > { %p3195_p9 = scmp.ge.s32.totalorder %s2628_s27, 2  ;;  %s2058_s9 = scalar_lea.sflag [#allocation4], %s2057_s29 }
 0xa6b   : > { %p2346_p12 = pnand %p3195_p9, %p3194_p7 }
 0xa6d   : > { %2611 = dma.done.wait (!%p2346_p12), %s2058_s9, 256  }
 0xa6e   : > { %2613 = vsyncadd (!%p2346_p12), %s2058_s9, 4294967040  ;;  %p21_p2 = scmp.ge.s32.totalorder %s2800_s13, 4   ;;  %s3196_s24 = smov %s2620_s25 }
 0xa6f   : > { %s3197_s25 = smov %s2624_s26  ;;  %s3198_s26 = smov %s2816_s17 }
 0xa70   : > { %s3199_s27 = smov %s2800_s13  ;;  %23 = sbr.rel (!%p21_p2) target bundleno = 6 (0x6), region = 101 }
 0xa77   :  { %2063 = vsyncpa [#allocation3], 1 }
 0xa78   :  { %2065 = vsyncpa [#allocation3 + $0x1], 1 }
 0xa79   :  { %2066 = vsyncpa [#allocation6], 1 }
 0xa7a   :  { %2067 = vsyncpa [#allocation4], 1 }
 0xa7b   :  { %2069 = vsyncpa [#allocation4 + $0x1], 1 }

</bundles_post_ra>
